<compile_context>
chip_gen: v6e
topology: v6e:2x2x1
jax: 0.10.0
libtpu: 0.0.40
codegen_flags: <defaults>
</compile_context>

<pallas_src>
import functools

import jax
import jax.numpy as jnp
from jax import lax
from jax.experimental import pallas as pl
from jax.experimental.pallas import tpu as pltpu

_INV_SQRT2 = 0.7071067811865476


def _gelu_exact(x):
    # Matches torch.nn.GELU() default (approximate='none').
    return 0.5 * x * (1.0 + lax.erf(x * _INV_SQRT2))


def _gelu_tanh(x):
    # EUP-friendly tanh approximation (opt-in accuracy trade, ~1e-3).
    return jax.nn.gelu(x, approximate=True)


def _layernorm(x, ln_w, ln_b):
    mu = jnp.mean(x, axis=-1, keepdims=True)
    xc = x - mu
    var = jnp.mean(xc * xc, axis=-1, keepdims=True)
    return xc * lax.rsqrt(var + 1e-5) * ln_w + ln_b


def _mm(a, b, operand_dtype):
    if operand_dtype is not None:
        a = a.astype(operand_dtype)
        b = b.astype(operand_dtype)
    return jnp.dot(a, b, preferred_element_type=jnp.float32)


def _fused_kernel(x_ref, ln_w_ref, ln_b_ref,
                  w1l_ref, b1l_ref, w1g_ref, b1g_ref,
                  w2l_ref, w2g_ref, b2_ref,
                  w3_ref, b3_ref, w4_ref, b4_ref,
                  out_ref,
                  acc_ref, bias2_ref,
                  *, n_tokens, token_tile, gelu, operand_dtype):
    phase = pl.program_id(1)          # 0 = reduce global half, 1 = predict
    t = pl.program_id(2)              # token tile
    is_reduce = phase == 0

    x = x_ref[0].astype(jnp.float32)                              # (TN, D)
    xn = _layernorm(x, ln_w_ref[...], ln_b_ref[...])              # (TN, D)

    # ---- phase 0: masked token-mean of the "global" half of layer1 ----
    @pl.when(jnp.logical_and(is_reduce, t == 0))
    def _():
        acc_ref[...] = jnp.zeros_like(acc_ref)

    @pl.when(is_reduce)
    def _():
        zg = gelu(_mm(xn, w1g_ref[...], operand_dtype) + b1g_ref[...])   # (TN, H/2)
        # Mask padded rows (token index >= true N) out of the mean.
        row = t * token_tile + lax.broadcasted_iota(jnp.int32, (token_tile, 1), 0)
        zg = jnp.where(row < n_tokens, zg, 0.0)
        acc_ref[...] += jnp.sum(zg, axis=0, keepdims=True)               # (1, H/2)

    @pl.when(jnp.logical_and(is_reduce, t == pl.num_programs(2) - 1))
    def _():
        g = acc_ref[...] * (1.0 / n_tokens)                              # true-N mean
        # bias2_eff = mean(z_global) @ w2[H/2:, :] + b2   (folded global half)
        bias2_ref[...] = _mm(g, w2g_ref[...], operand_dtype) + b2_ref[...]

    # ---- phase 1: per-token-tile output with the folded layer-2 bias ----
    @pl.when(phase == 1)
    def _():
        zl = gelu(_mm(xn, w1l_ref[...], operand_dtype) + b1l_ref[...])      # (TN, H/2)
        h1 = gelu(_mm(zl, w2l_ref[...], operand_dtype) + bias2_ref[...])    # (TN, H/2)
        h2 = gelu(_mm(h1, w3_ref[...], operand_dtype) + b3_ref[...])        # (TN, H/4)
        # Final Linear(H/4 -> 1): VPU multiply + lane reduce, then a tiny
        # (TN,1)->(1,TN) transpose for a lane-dense store.
        o = jnp.sum(h2 * w4_ref[...], axis=-1, keepdims=True) + b4_ref[...]  # (TN, 1)
        out_ref[0] = jnp.transpose(o).astype(out_ref.dtype)                 # (1, TN)


def _pick_token_tile(n, target=512):
    """Prefer 512/256-token tiles with >=4 steps; otherwise 128 (N is padded up)."""
    if n <= 128:
        return 128
    for tn in (1024, 512, 256):
        if tn <= target and pl.cdiv(n, tn) >= 4:
            return tn
    return 128


def _vmem_limit_bytes(tn, d, h):
    """Block + live-intermediate footprint estimate, 2x headroom, <= v7x ceiling."""
    h2, h4 = h // 2, h // 4
    f32 = 4
    x_blk = tn * d * f32
    out_blk = tn * f32
    weights = (2 * d + d * h + h + h * h2 + h2 + h2 * h4 + 2 * h4 + 1) * f32
    interm = tn * (d + 3 * h2 + h4 + 1) * f32
    est = 2 * x_blk + 2 * out_blk + 2 * weights + 2 * interm + 4 * h2 * f32
    return int(max(16 * 2**20, min(56 * 2**20, 2 * est)))


def mask_predictor_pallas(x, params, *, token_tile=None, use_tanh_gelu=False,
                          matmul_dtype=None):
    """x: (B, N, in_dim). params: dict of weights (see init_params).

    use_tanh_gelu / matmul_dtype are opt-in accuracy trades (default keeps
    exact-erf GELU and f32 MXU operands -> 1e-5 parity with the torch module).
    """
    B, N, D = x.shape
    H = params["w1"].shape[1]
    H2, H4 = H // 2, H // 4

    TN = token_tile or _pick_token_tile(N)
    T = pl.cdiv(N, TN)
    N_pad = T * TN
    if N_pad != N:
        x = jnp.pad(x, ((0, 0), (0, N_pad - N), (0, 0)))

    # Column/row splits of the layer-1 / layer-2 weights (pure slicing in JAX).
    w1l, w1g = params["w1"][:, :H2], params["w1"][:, H2:]
    b1l, b1g = params["b1"][:, :H2], params["b1"][:, H2:]
    w2l, w2g = params["w2"][:H2, :], params["w2"][H2:, :]
    w4row = params["w4"].reshape(1, H4)

    # Tiny weights/biases: full-array blocks with a constant index_map.
    def rep(a):
        return pl.BlockSpec(a.shape, lambda b, p, t: (0,) * a.ndim)

    gelu = _gelu_tanh if use_tanh_gelu else _gelu_exact
    kernel = functools.partial(_fused_kernel, n_tokens=N, token_tile=TN,
                               gelu=gelu, operand_dtype=matmul_dtype)

    out = pl.pallas_call(
        kernel,
        out_shape=jax.ShapeDtypeStruct((B, 1, N_pad), x.dtype),
        grid_spec=pltpu.PrefetchScalarGridSpec(
            num_scalar_prefetch=0,
            grid=(B, 2, T),
            in_specs=[
                pl.BlockSpec((1, TN, D), lambda b, p, t: (b, t, 0)),   # x
                rep(params["ln_w"]), rep(params["ln_b"]),
                rep(w1l), rep(b1l), rep(w1g), rep(b1g),
                rep(w2l), rep(w2g), rep(params["b2"]),
                rep(params["w3"]), rep(params["b3"]),
                rep(w4row), rep(params["b4"]),
            ],
            # Phase 0 parks on block (b,0,0) (never flushed before phase 1
            # rewrites it); phase 1 walks the lane-dense (1, TN) row tiles.
            out_specs=pl.BlockSpec((1, 1, TN), lambda b, p, t: (b, 0, t * p)),
            scratch_shapes=[pltpu.VMEM((1, H2), jnp.float32),   # token-sum acc
                            pltpu.VMEM((1, H2), jnp.float32)],  # folded bias2_eff
        ),
        compiler_params=pltpu.CompilerParams(
            dimension_semantics=("parallel", "arbitrary", "arbitrary"),
            vmem_limit_bytes=_vmem_limit_bytes(TN, D, H)),
    )(x, params["ln_w"], params["ln_b"], w1l, b1l, w1g, b1g,
      w2l, w2g, params["b2"], params["w3"], params["b3"], w4row, params["b4"])

    # (B, 1, N_pad) -> slice padding -> (B, N, 1) to match the module's output.
    return out[:, 0, :N].reshape(B, N, 1)


def init_params(key, in_dim, h_dim):
    """Deterministic synthetic parameters. Linear weights stored as (in, out)."""
    ks = jax.random.split(key, 8)
    scale = 0.02
    return {
        "ln_w": jnp.ones((1, in_dim), jnp.float32),
        "ln_b": jnp.zeros((1, in_dim), jnp.float32),
        "w1": scale * jax.random.normal(ks[0], (in_dim, h_dim), jnp.float32),
        "b1": scale * jax.random.normal(ks[1], (1, h_dim), jnp.float32),
        "w2": scale * jax.random.normal(ks[2], (h_dim, h_dim // 2), jnp.float32),
        "b2": scale * jax.random.normal(ks[3], (1, h_dim // 2), jnp.float32),
        "w3": scale * jax.random.normal(ks[4], (h_dim // 2, h_dim // 4), jnp.float32),
        "b3": scale * jax.random.normal(ks[5], (1, h_dim // 4), jnp.float32),
        "w4": scale * jax.random.normal(ks[6], (h_dim // 4, 1), jnp.float32),
        "b4": scale * jax.random.normal(ks[7], (1, 1), jnp.float32),
    }


def mask_predictor_ref(x, p):
    """Pure-JAX reference (mirrors the PyTorch forward exactly)."""
    mu = jnp.mean(x, axis=-1, keepdims=True)
    var = jnp.mean((x - mu) ** 2, axis=-1, keepdims=True)
    xn = (x - mu) / jnp.sqrt(var + 1e-5) * p["ln_w"][0] + p["ln_b"][0]
    z = _gelu_exact(xn @ p["w1"] + p["b1"][0])
    h = z.shape[-1]
    z_local, z_global = z[..., : h // 2], z[..., h // 2:]
    z_global = jnp.broadcast_to(jnp.mean(z_global, axis=1, keepdims=True), z_local.shape)
    z = jnp.concatenate([z_local, z_global], axis=-1)
    h1 = _gelu_exact(z @ p["w2"] + p["b2"][0])
    h2 = _gelu_exact(h1 @ p["w3"] + p["b3"][0])
    return h2 @ p["w4"] + p["b4"][0]


if __name__ == "__main__":
    key = jax.random.PRNGKey(0)

    def check(B, N, in_dim, h_dim):
        k_x, k_p = jax.random.split(jax.random.fold_in(key, N))
        x = jax.random.normal(k_x, (B, N, in_dim), jnp.float32)
        params = init_params(k_p, in_dim, h_dim)
        out = jax.block_until_ready(mask_predictor_pallas(x, params))
        ref = mask_predictor_ref(x, params)
        assert out.shape == (B, N, 1), out.shape
        err = float(jnp.max(jnp.abs(out - ref)))
        assert jnp.allclose(out, ref, atol=1e-5, rtol=1e-5), err

    # Ragged N (pads 300 -> 384: three 128-token tiles) exercises the masked
    # phase-0 mean, multi-tile accumulation and the lane-dense (1, TN) store.
    check(2, 300, 32, 32)
    # Tiny N with heavy padding (8 -> 128, single tile) and B=1.
    check(1, 8, 32, 32)

    print("KERNEL_OK")
</pallas_src>

<mosaic_0001>
module attributes {stable_mosaic.version = 11 : i64} {
  func.func @_fused_kernel(%arg0: i32, %arg1: i32, %arg2: i32, %arg3: memref<1x128x32xf32, #tpu.memory_space<vmem>>, %arg4: memref<1x32xf32, #tpu.memory_space<vmem>>, %arg5: memref<1x32xf32, #tpu.memory_space<vmem>>, %arg6: memref<32x16xf32, #tpu.memory_space<vmem>>, %arg7: memref<1x16xf32, #tpu.memory_space<vmem>>, %arg8: memref<32x16xf32, #tpu.memory_space<vmem>>, %arg9: memref<1x16xf32, #tpu.memory_space<vmem>>, %arg10: memref<16x16xf32, #tpu.memory_space<vmem>>, %arg11: memref<16x16xf32, #tpu.memory_space<vmem>>, %arg12: memref<1x16xf32, #tpu.memory_space<vmem>>, %arg13: memref<16x8xf32, #tpu.memory_space<vmem>>, %arg14: memref<1x8xf32, #tpu.memory_space<vmem>>, %arg15: memref<1x8xf32, #tpu.memory_space<vmem>>, %arg16: memref<1x1xf32, #tpu.memory_space<vmem>>, %arg17: memref<1x1x128xf32, #tpu.memory_space<vmem>>, %arg18: memref<1x16xf32, #tpu.memory_space<vmem>>, %arg19: memref<1x16xf32, #tpu.memory_space<vmem>>) attributes {dimension_semantics = [#tpu.dimension_semantics<parallel>, #tpu.dimension_semantics<arbitrary>, #tpu.dimension_semantics<arbitrary>], iteration_bounds = array<i64: 2, 2, 3>, scalar_prefetch = 0 : i64, scratch_operands = 2 : i64, tpu.core_type = #tpu.core_type<tc>, window_params = [{transform_indices = @transform_0, window_bounds = array<i64: 1, 128, 32>}, {pipeline_mode = #tpu.pipeline_mode<synchronous>, transform_indices = @transform_1, window_bounds = array<i64: 1, 32>}, {pipeline_mode = #tpu.pipeline_mode<synchronous>, transform_indices = @transform_2, window_bounds = array<i64: 1, 32>}, {pipeline_mode = #tpu.pipeline_mode<synchronous>, transform_indices = @transform_3, window_bounds = array<i64: 32, 16>}, {pipeline_mode = #tpu.pipeline_mode<synchronous>, transform_indices = @transform_4, window_bounds = array<i64: 1, 16>}, {pipeline_mode = #tpu.pipeline_mode<synchronous>, transform_indices = @transform_5, window_bounds = array<i64: 32, 16>}, {pipeline_mode = #tpu.pipeline_mode<synchronous>, transform_indices = @transform_6, window_bounds = array<i64: 1, 16>}, {pipeline_mode = #tpu.pipeline_mode<synchronous>, transform_indices = @transform_7, window_bounds = array<i64: 16, 16>}, {pipeline_mode = #tpu.pipeline_mode<synchronous>, transform_indices = @transform_8, window_bounds = array<i64: 16, 16>}, {pipeline_mode = #tpu.pipeline_mode<synchronous>, transform_indices = @transform_9, window_bounds = array<i64: 1, 16>}, {pipeline_mode = #tpu.pipeline_mode<synchronous>, transform_indices = @transform_10, window_bounds = array<i64: 16, 8>}, {pipeline_mode = #tpu.pipeline_mode<synchronous>, transform_indices = @transform_11, window_bounds = array<i64: 1, 8>}, {pipeline_mode = #tpu.pipeline_mode<synchronous>, transform_indices = @transform_12, window_bounds = array<i64: 1, 8>}, {pipeline_mode = #tpu.pipeline_mode<synchronous>, transform_indices = @transform_13, window_bounds = array<i64: 1, 1>}, {transform_indices = @transform_14, window_bounds = array<i64: 1, 1, 128>}]} {
    %c0_i32 = arith.constant 0 : i32
    %0 = arith.cmpi eq, %arg1, %c0_i32 : i32
    %c0 = arith.constant 0 : index
    %c0_0 = arith.constant 0 : index
    %c0_1 = arith.constant 0 : index
    %1 = vector.load %arg3[%c0, %c0_0, %c0_1] : memref<1x128x32xf32, #tpu.memory_space<vmem>>, vector<1x128x32xf32>
    %2 = vector.shape_cast %1 : vector<1x128x32xf32> to vector<128x32xf32>
    %c0_2 = arith.constant 0 : index
    %c0_3 = arith.constant 0 : index
    %3 = vector.load %arg4[%c0_2, %c0_3] : memref<1x32xf32, #tpu.memory_space<vmem>>, vector<1x32xf32>
    %c0_4 = arith.constant 0 : index
    %c0_5 = arith.constant 0 : index
    %4 = vector.load %arg5[%c0_4, %c0_5] : memref<1x32xf32, #tpu.memory_space<vmem>>, vector<1x32xf32>
    %cst = arith.constant dense<0.000000e+00> : vector<128xf32>
    %5 = vector.multi_reduction <add>, %2, %cst [1] : vector<128x32xf32> to vector<128xf32>
    %6 = vector.shape_cast %5 : vector<128xf32> to vector<128x1xf32>
    %cst_6 = arith.constant 3.200000e+01 : f32
    %7 = vector.broadcast %cst_6 : f32 to vector<128x1xf32>
    %8 = arith.divf %6, %7 : vector<128x1xf32>
    %9 = vector.broadcast %8 : vector<128x1xf32> to vector<128x32xf32>
    %10 = arith.subf %2, %9 : vector<128x32xf32>
    %11 = arith.mulf %10, %10 : vector<128x32xf32>
    %cst_7 = arith.constant dense<0.000000e+00> : vector<128xf32>
    %12 = vector.multi_reduction <add>, %11, %cst_7 [1] : vector<128x32xf32> to vector<128xf32>
    %13 = vector.shape_cast %12 : vector<128xf32> to vector<128x1xf32>
    %cst_8 = arith.constant 3.200000e+01 : f32
    %14 = vector.broadcast %cst_8 : f32 to vector<128x1xf32>
    %15 = arith.divf %13, %14 : vector<128x1xf32>
    %cst_9 = arith.constant 9.99999974E-6 : f32
    %16 = vector.broadcast %cst_9 : f32 to vector<128x1xf32>
    %17 = arith.addf %15, %16 : vector<128x1xf32>
    %18 = math.rsqrt %17 : vector<128x1xf32>
    %19 = vector.broadcast %18 : vector<128x1xf32> to vector<128x32xf32>
    %20 = arith.mulf %10, %19 : vector<128x32xf32>
    %21 = vector.broadcast %3 : vector<1x32xf32> to vector<128x32xf32>
    %22 = arith.mulf %20, %21 : vector<128x32xf32>
    %23 = vector.broadcast %4 : vector<1x32xf32> to vector<128x32xf32>
    %24 = arith.addf %22, %23 : vector<128x32xf32>
    %c0_i32_10 = arith.constant 0 : i32
    %25 = arith.cmpi eq, %arg2, %c0_i32_10 : i32
    %26 = arith.andi %0, %25 : i1
    %27 = arith.extui %26 : i1 to i32
    %c0_i32_11 = arith.constant 0 : i32
    %28 = arith.cmpi ne, %27, %c0_i32_11 : i32
    scf.if %28 {
      %cst_15 = arith.constant 0.000000e+00 : f32
      %38 = vector.broadcast %cst_15 : f32 to vector<1x16xf32>
      %c0_16 = arith.constant 0 : index
      %c0_17 = arith.constant 0 : index
      %39 = vector.load %arg18[%c0_16, %c0_17] : memref<1x16xf32, #tpu.memory_space<vmem>>, vector<1x16xf32>
      tpu.vector_store %arg18[%c0_16, %c0_17], %38 {strides = array<i32>} : memref<1x16xf32, #tpu.memory_space<vmem>>, vector<1x16xf32>,
    } else {
    }
    %29 = arith.extui %0 : i1 to i32
    %c0_i32_12 = arith.constant 0 : i32
    %30 = arith.cmpi ne, %29, %c0_i32_12 : i32
    scf.if %30 {
      %c0_15 = arith.constant 0 : index
      %c0_16 = arith.constant 0 : index
      %38 = vector.load %arg8[%c0_15, %c0_16] : memref<32x16xf32, #tpu.memory_space<vmem>>, vector<32x16xf32>
      %cst_17 = arith.constant dense<0.000000e+00> : vector<128x16xf32>
      %39 = tpu.matmul %24, %38, %cst_17 {dimension_numbers = #tpu.dot_dimension_numbers<[1], [0], [0], [1], [0, 0, 1, 1], [], []>} : vector<128x32xf32>, vector<32x16xf32>, vector<128x16xf32> -> vector<128x16xf32>
      %c0_18 = arith.constant 0 : index
      %c0_19 = arith.constant 0 : index
      %40 = vector.load %arg9[%c0_18, %c0_19] : memref<1x16xf32, #tpu.memory_space<vmem>>, vector<1x16xf32>
      %41 = vector.broadcast %40 : vector<1x16xf32> to vector<128x16xf32>
      %42 = arith.addf %39, %41 : vector<128x16xf32>
      %cst_20 = arith.constant 5.000000e-01 : f32
      %43 = vector.broadcast %cst_20 : f32 to vector<128x16xf32>
      %44 = arith.mulf %43, %42 : vector<128x16xf32>
      %cst_21 = arith.constant 0.707106769 : f32
      %45 = vector.broadcast %cst_21 : f32 to vector<128x16xf32>
      %46 = arith.mulf %42, %45 : vector<128x16xf32>
      %47 = math.erf %46 : vector<128x16xf32>
      %cst_22 = arith.constant 1.000000e+00 : f32
      %48 = vector.broadcast %cst_22 : f32 to vector<128x16xf32>
      %49 = arith.addf %48, %47 : vector<128x16xf32>
      %50 = arith.mulf %44, %49 : vector<128x16xf32>
      %c128_i32 = arith.constant 128 : i32
      %51 = arith.muli %arg2, %c128_i32 : i32
      %52 = tpu.iota {dimensions = array<i32: 0>} : vector<128x1xi32>
      %53 = vector.broadcast %51 : i32 to vector<128x1xi32>
      %54 = arith.addi %53, %52 : vector<128x1xi32>
      %c300_i32 = arith.constant 300 : i32
      %55 = vector.broadcast %c300_i32 : i32 to vector<128x1xi32>
      %56 = arith.cmpi slt, %54, %55 : vector<128x1xi32>
      %cst_23 = arith.constant 0.000000e+00 : f32
      %57 = vector.shape_cast %56 : vector<128x1xi1> to vector<128x1xi1>
      %58 = vector.broadcast %57 : vector<128x1xi1> to vector<128x16xi1>
      %59 = vector.broadcast %cst_23 : f32 to vector<128x16xf32>
      %60 = arith.select %58, %50, %59 : vector<128x16xi1>, vector<128x16xf32>
      %c0_24 = arith.constant 0 : index
      %c0_25 = arith.constant 0 : index
      %61 = vector.load %arg18[%c0_24, %c0_25] : memref<1x16xf32, #tpu.memory_space<vmem>>, vector<1x16xf32>
      %cst_26 = arith.constant dense<0.000000e+00> : vector<16xf32>
      %62 = vector.multi_reduction <add>, %60, %cst_26 [0] : vector<128x16xf32> to vector<16xf32>
      %63 = vector.shape_cast %62 : vector<16xf32> to vector<1x16xf32>
      %64 = arith.addf %61, %63 : vector<1x16xf32>
      %c0_27 = arith.constant 0 : index
      %c0_28 = arith.constant 0 : index
      %65 = vector.load %arg18[%c0_27, %c0_28] : memref<1x16xf32, #tpu.memory_space<vmem>>, vector<1x16xf32>
      tpu.vector_store %arg18[%c0_27, %c0_28], %64 {strides = array<i32>} : memref<1x16xf32, #tpu.memory_space<vmem>>, vector<1x16xf32>,
    } else {
    }
    %c2_i32 = arith.constant 2 : i32
    %31 = arith.cmpi eq, %arg2, %c2_i32 : i32
    %32 = arith.andi %0, %31 : i1
    %33 = arith.extui %32 : i1 to i32
    %c0_i32_13 = arith.constant 0 : i32
    %34 = arith.cmpi ne, %33, %c0_i32_13 : i32
    scf.if %34 {
      %c0_15 = arith.constant 0 : index
      %c0_16 = arith.constant 0 : index
      %38 = vector.load %arg18[%c0_15, %c0_16] : memref<1x16xf32, #tpu.memory_space<vmem>>, vector<1x16xf32>
      %cst_17 = arith.constant 0.00333333341 : f32
      %39 = vector.broadcast %cst_17 : f32 to vector<1x16xf32>
      %40 = arith.mulf %38, %39 : vector<1x16xf32>
      %c0_18 = arith.constant 0 : index
      %c0_19 = arith.constant 0 : index
      %41 = vector.load %arg11[%c0_18, %c0_19] : memref<16x16xf32, #tpu.memory_space<vmem>>, vector<16x16xf32>
      %cst_20 = arith.constant dense<0.000000e+00> : vector<1x16xf32>
      %42 = tpu.matmul %40, %41, %cst_20 {dimension_numbers = #tpu.dot_dimension_numbers<[1], [0], [0], [1], [0, 0, 1, 1], [], []>} : vector<1x16xf32>, vector<16x16xf32>, vector<1x16xf32> -> vector<1x16xf32>
      %c0_21 = arith.constant 0 : index
      %c0_22 = arith.constant 0 : index
      %43 = vector.load %arg12[%c0_21, %c0_22] : memref<1x16xf32, #tpu.memory_space<vmem>>, vector<1x16xf32>
      %44 = arith.addf %42, %43 : vector<1x16xf32>
      %c0_23 = arith.constant 0 : index
      %c0_24 = arith.constant 0 : index
      %45 = vector.load %arg19[%c0_23, %c0_24] : memref<1x16xf32, #tpu.memory_space<vmem>>, vector<1x16xf32>
      tpu.vector_store %arg19[%c0_23, %c0_24], %44 {strides = array<i32>} : memref<1x16xf32, #tpu.memory_space<vmem>>, vector<1x16xf32>,
    } else {
    }
    %c1_i32 = arith.constant 1 : i32
    %35 = arith.cmpi eq, %arg1, %c1_i32 : i32
    %36 = arith.extui %35 : i1 to i32
    %c0_i32_14 = arith.constant 0 : i32
    %37 = arith.cmpi ne, %36, %c0_i32_14 : i32
    scf.if %37 {
      %c0_15 = arith.constant 0 : index
      %c0_16 = arith.constant 0 : index
      %38 = vector.load %arg6[%c0_15, %c0_16] : memref<32x16xf32, #tpu.memory_space<vmem>>, vector<32x16xf32>
      %cst_17 = arith.constant dense<0.000000e+00> : vector<128x16xf32>
      %39 = tpu.matmul %24, %38, %cst_17 {dimension_numbers = #tpu.dot_dimension_numbers<[1], [0], [0], [1], [0, 0, 1, 1], [], []>} : vector<128x32xf32>, vector<32x16xf32>, vector<128x16xf32> -> vector<128x16xf32>
      %c0_18 = arith.constant 0 : index
      %c0_19 = arith.constant 0 : index
      %40 = vector.load %arg7[%c0_18, %c0_19] : memref<1x16xf32, #tpu.memory_space<vmem>>, vector<1x16xf32>
      %41 = vector.broadcast %40 : vector<1x16xf32> to vector<128x16xf32>
      %42 = arith.addf %39, %41 : vector<128x16xf32>
      %cst_20 = arith.constant 5.000000e-01 : f32
      %43 = vector.broadcast %cst_20 : f32 to vector<128x16xf32>
      %44 = arith.mulf %43, %42 : vector<128x16xf32>
      %cst_21 = arith.constant 0.707106769 : f32
      %45 = vector.broadcast %cst_21 : f32 to vector<128x16xf32>
      %46 = arith.mulf %42, %45 : vector<128x16xf32>
      %47 = math.erf %46 : vector<128x16xf32>
      %cst_22 = arith.constant 1.000000e+00 : f32
      %48 = vector.broadcast %cst_22 : f32 to vector<128x16xf32>
      %49 = arith.addf %48, %47 : vector<128x16xf32>
      %50 = arith.mulf %44, %49 : vector<128x16xf32>
      %c0_23 = arith.constant 0 : index
      %c0_24 = arith.constant 0 : index
      %51 = vector.load %arg10[%c0_23, %c0_24] : memref<16x16xf32, #tpu.memory_space<vmem>>, vector<16x16xf32>
      %cst_25 = arith.constant dense<0.000000e+00> : vector<128x16xf32>
      %52 = tpu.matmul %50, %51, %cst_25 {dimension_numbers = #tpu.dot_dimension_numbers<[1], [0], [0], [1], [0, 0, 1, 1], [], []>} : vector<128x16xf32>, vector<16x16xf32>, vector<128x16xf32> -> vector<128x16xf32>
      %c0_26 = arith.constant 0 : index
      %c0_27 = arith.constant 0 : index
      %53 = vector.load %arg19[%c0_26, %c0_27] : memref<1x16xf32, #tpu.memory_space<vmem>>, vector<1x16xf32>
      %54 = vector.broadcast %53 : vector<1x16xf32> to vector<128x16xf32>
      %55 = arith.addf %52, %54 : vector<128x16xf32>
      %cst_28 = arith.constant 5.000000e-01 : f32
      %56 = vector.broadcast %cst_28 : f32 to vector<128x16xf32>
      %57 = arith.mulf %56, %55 : vector<128x16xf32>
      %cst_29 = arith.constant 0.707106769 : f32
      %58 = vector.broadcast %cst_29 : f32 to vector<128x16xf32>
      %59 = arith.mulf %55, %58 : vector<128x16xf32>
      %60 = math.erf %59 : vector<128x16xf32>
      %cst_30 = arith.constant 1.000000e+00 : f32
      %61 = vector.broadcast %cst_30 : f32 to vector<128x16xf32>
      %62 = arith.addf %61, %60 : vector<128x16xf32>
      %63 = arith.mulf %57, %62 : vector<128x16xf32>
      %c0_31 = arith.constant 0 : index
      %c0_32 = arith.constant 0 : index
      %64 = vector.load %arg13[%c0_31, %c0_32] : memref<16x8xf32, #tpu.memory_space<vmem>>, vector<16x8xf32>
      %cst_33 = arith.constant dense<0.000000e+00> : vector<128x8xf32>
      %65 = tpu.matmul %63, %64, %cst_33 {dimension_numbers = #tpu.dot_dimension_numbers<[1], [0], [0], [1], [0, 0, 1, 1], [], []>} : vector<128x16xf32>, vector<16x8xf32>, vector<128x8xf32> -> vector<128x8xf32>
      %c0_34 = arith.constant 0 : index
      %c0_35 = arith.constant 0 : index
      %66 = vector.load %arg14[%c0_34, %c0_35] : memref<1x8xf32, #tpu.memory_space<vmem>>, vector<1x8xf32>
      %67 = vector.broadcast %66 : vector<1x8xf32> to vector<128x8xf32>
      %68 = arith.addf %65, %67 : vector<128x8xf32>
      %cst_36 = arith.constant 5.000000e-01 : f32
      %69 = vector.broadcast %cst_36 : f32 to vector<128x8xf32>
      %70 = arith.mulf %69, %68 : vector<128x8xf32>
      %cst_37 = arith.constant 0.707106769 : f32
      %71 = vector.broadcast %cst_37 : f32 to vector<128x8xf32>
      %72 = arith.mulf %68, %71 : vector<128x8xf32>
      %73 = math.erf %72 : vector<128x8xf32>
      %cst_38 = arith.constant 1.000000e+00 : f32
      %74 = vector.broadcast %cst_38 : f32 to vector<128x8xf32>
      %75 = arith.addf %74, %73 : vector<128x8xf32>
      %76 = arith.mulf %70, %75 : vector<128x8xf32>
      %c0_39 = arith.constant 0 : index
      %c0_40 = arith.constant 0 : index
      %77 = vector.load %arg15[%c0_39, %c0_40] : memref<1x8xf32, #tpu.memory_space<vmem>>, vector<1x8xf32>
      %78 = vector.broadcast %77 : vector<1x8xf32> to vector<128x8xf32>
      %79 = arith.mulf %76, %78 : vector<128x8xf32>
      %cst_41 = arith.constant dense<0.000000e+00> : vector<128xf32>
      %80 = vector.multi_reduction <add>, %79, %cst_41 [1] : vector<128x8xf32> to vector<128xf32>
      %81 = vector.shape_cast %80 : vector<128xf32> to vector<128x1xf32>
      %c0_42 = arith.constant 0 : index
      %c0_43 = arith.constant 0 : index
      %82 = vector.load %arg16[%c0_42, %c0_43] : memref<1x1xf32, #tpu.memory_space<vmem>>, vector<1x1xf32>
      %83 = vector.broadcast %82 : vector<1x1xf32> to vector<128x1xf32>
      %84 = arith.addf %81, %83 : vector<128x1xf32>
      %85 = tpu.transpose %84, [1, 0] : vector<128x1xf32> -> vector<1x128xf32>
      %c0_44 = arith.constant 0 : index
      %c0_45 = arith.constant 0 : index
      %c0_46 = arith.constant 0 : index
      %86 = vector.load %arg17[%c0_44, %c0_45, %c0_46] : memref<1x1x128xf32, #tpu.memory_space<vmem>>, vector<1x1x128xf32>
      %87 = vector.shape_cast %86 : vector<1x1x128xf32> to vector<1x128xf32>
      %88 = vector.shape_cast %85 : vector<1x128xf32> to vector<1x1x128xf32>
      tpu.vector_store %arg17[%c0_44, %c0_45, %c0_46], %88 {strides = array<i32>} : memref<1x1x128xf32, #tpu.memory_space<vmem>>, vector<1x1x128xf32>,
    } else {
    }
    return
  }
  func.func @transform_0(%arg0: i32, %arg1: i32, %arg2: i32) -> (i32, i32, i32) {
    %c0_i32 = arith.constant 0 : i32
    %c0_i32_0 = arith.constant 0 : i32
    return %arg0, %arg2, %c0_i32 : i32, i32, i32
  }
  func.func @transform_1(%arg0: i32, %arg1: i32, %arg2: i32) -> (i32, i32) {
    %c0_i32 = arith.constant 0 : i32
    %c0_i32_0 = arith.constant 0 : i32
    %c0_i32_1 = arith.constant 0 : i32
    return %c0_i32, %c0_i32_0 : i32, i32
  }
  func.func @transform_2(%arg0: i32, %arg1: i32, %arg2: i32) -> (i32, i32) {
    %c0_i32 = arith.constant 0 : i32
    %c0_i32_0 = arith.constant 0 : i32
    %c0_i32_1 = arith.constant 0 : i32
    return %c0_i32, %c0_i32_0 : i32, i32
  }
  func.func @transform_3(%arg0: i32, %arg1: i32, %arg2: i32) -> (i32, i32) {
    %c0_i32 = arith.constant 0 : i32
    %c0_i32_0 = arith.constant 0 : i32
    %c0_i32_1 = arith.constant 0 : i32
    return %c0_i32, %c0_i32_0 : i32, i32
  }
  func.func @transform_4(%arg0: i32, %arg1: i32, %arg2: i32) -> (i32, i32) {
    %c0_i32 = arith.constant 0 : i32
    %c0_i32_0 = arith.constant 0 : i32
    %c0_i32_1 = arith.constant 0 : i32
    return %c0_i32, %c0_i32_0 : i32, i32
  }
  func.func @transform_5(%arg0: i32, %arg1: i32, %arg2: i32) -> (i32, i32) {
    %c0_i32 = arith.constant 0 : i32
    %c0_i32_0 = arith.constant 0 : i32
    %c0_i32_1 = arith.constant 0 : i32
    return %c0_i32, %c0_i32_0 : i32, i32
  }
  func.func @transform_6(%arg0: i32, %arg1: i32, %arg2: i32) -> (i32, i32) {
    %c0_i32 = arith.constant 0 : i32
    %c0_i32_0 = arith.constant 0 : i32
    %c0_i32_1 = arith.constant 0 : i32
    return %c0_i32, %c0_i32_0 : i32, i32
  }
  func.func @transform_7(%arg0: i32, %arg1: i32, %arg2: i32) -> (i32, i32) {
    %c0_i32 = arith.constant 0 : i32
    %c0_i32_0 = arith.constant 0 : i32
    %c0_i32_1 = arith.constant 0 : i32
    return %c0_i32, %c0_i32_0 : i32, i32
  }
  func.func @transform_8(%arg0: i32, %arg1: i32, %arg2: i32) -> (i32, i32) {
    %c0_i32 = arith.constant 0 : i32
    %c0_i32_0 = arith.constant 0 : i32
    %c0_i32_1 = arith.constant 0 : i32
    return %c0_i32, %c0_i32_0 : i32, i32
  }
  func.func @transform_9(%arg0: i32, %arg1: i32, %arg2: i32) -> (i32, i32) {
    %c0_i32 = arith.constant 0 : i32
    %c0_i32_0 = arith.constant 0 : i32
    %c0_i32_1 = arith.constant 0 : i32
    return %c0_i32, %c0_i32_0 : i32, i32
  }
  func.func @transform_10(%arg0: i32, %arg1: i32, %arg2: i32) -> (i32, i32) {
    %c0_i32 = arith.constant 0 : i32
    %c0_i32_0 = arith.constant 0 : i32
    %c0_i32_1 = arith.constant 0 : i32
    return %c0_i32, %c0_i32_0 : i32, i32
  }
  func.func @transform_11(%arg0: i32, %arg1: i32, %arg2: i32) -> (i32, i32) {
    %c0_i32 = arith.constant 0 : i32
    %c0_i32_0 = arith.constant 0 : i32
    %c0_i32_1 = arith.constant 0 : i32
    return %c0_i32, %c0_i32_0 : i32, i32
  }
  func.func @transform_12(%arg0: i32, %arg1: i32, %arg2: i32) -> (i32, i32) {
    %c0_i32 = arith.constant 0 : i32
    %c0_i32_0 = arith.constant 0 : i32
    %c0_i32_1 = arith.constant 0 : i32
    return %c0_i32, %c0_i32_0 : i32, i32
  }
  func.func @transform_13(%arg0: i32, %arg1: i32, %arg2: i32) -> (i32, i32) {
    %c0_i32 = arith.constant 0 : i32
    %c0_i32_0 = arith.constant 0 : i32
    %c0_i32_1 = arith.constant 0 : i32
    return %c0_i32, %c0_i32_0 : i32, i32
  }
  func.func @transform_14(%arg0: i32, %arg1: i32, %arg2: i32) -> (i32, i32, i32) {
    %0 = arith.muli %arg2, %arg1 : i32
    %c0_i32 = arith.constant 0 : i32
    %c0_i32_0 = arith.constant 0 : i32
    return %arg0, %c0_i32, %0 : i32, i32, i32
  }
}

</mosaic_0001>

<bundles_post_ra>
// kernel: tpu_custom_call.1
= control target key start
LH: loop header
LB: loop body
LE: loop exit
PB: predicated region body
PF: predicated region fallthrough
CT: control target
= control target key end

     0   :  { %s4030_s0 = inlined_call_operand.vmem [shape: f32[2,384,32], index: 0, kind: input, shape index: {}]   ;;  %s4031_s1 = inlined_call_operand.vmem [shape: f32[1,32], index: 1, kind: input, shape index: {}]   ;;  %s4032_s2 = inlined_call_operand.vmem [shape: f32[1,32], index: 2, kind: input, shape index: {}]   ;;  %s4033_s3 = inlined_call_operand.vmem [shape: f32[32,16], index: 3, kind: input, shape index: {}]   ;;  %s4034_s4 = inlined_call_operand.vmem [shape: f32[1,16], index: 4, kind: input, shape index: {}]   ;;  %s4035_s5 = inlined_call_operand.vmem [shape: f32[32,16], index: 5, kind: input, shape index: {}]   ;;  %s4036_s6 = inlined_call_operand.vmem [shape: f32[1,16], index: 6, kind: input, shape index: {}]   ;;  %s4037_s7 = inlined_call_operand.vmem [shape: f32[16,16], index: 7, kind: input, shape index: {}]   ;;  %s4038_s8 = inlined_call_operand.vmem [shape: f32[16,16], index: 8, kind: input, shape index: {}]   ;;  %s4039_s9 = inlined_call_operand.vmem [shape: f32[1,16], index: 9, kind: input, shape index: {}]   ;;  %s4040_s10 = inlined_call_operand.vmem [shape: f32[16,8], index: 10, kind: input, shape index: {}]   ;;  %s4041_s11 = inlined_call_operand.vmem [shape: f32[1,8], index: 11, kind: input, shape index: {}]   ;;  %s4042_s12 = inlined_call_operand.vmem [shape: f32[1,8], index: 12, kind: input, shape index: {}]   ;;  %s4043_s13 = inlined_call_operand.<no memory space> [shape: f32[1,1], index: 13, kind: input, shape index: {}]   ;;  %s4044_s14 = inlined_call_operand.hbm [shape: f32[2,1,384], index: 14, kind: output, shape index: {}]  }
   0x1   :  { %4058 = sst [smem:[#allocation17_spill]] %s4030_s0  ;;  %v19_v0 = vstv %s4043_s13 }
   0x2   :  { %4059 = sst [smem:[#allocation18_spill]] %s4031_s1  ;;  %20 = vst [vmem:[#allocation4] sm:$0x1] %v19_v0 }
   0x3   :  { %4060 = sst [smem:[#allocation19_spill]] %s4032_s2 }
   0x4   :  { %4061 = sst [smem:[#allocation20_spill]] %s4033_s3 }
   0x5   :  { %4062 = sst [smem:[#allocation21_spill]] %s4034_s4 }
   0x6   :  { %4063 = sst [smem:[#allocation22_spill]] %s4044_s14 }
   0x7   :  { %21 = vsyncpa [#allocation6], 0 }
   0x8   :  { %23 = vsyncpa [#allocation6 + $0x1], 0  ;;  %s3126_s15 = smov 0   ;;  %s3128_s16 = smov 0  }
   0x9   :  { %s3130_s17 = smov 0   ;;  %s3132_s18 = smov 0  }
   0xa   :  { %s3134_s19 = smov 0   ;;  %s3136_s20 = smov 0  }
   0xb   :  { %s3138_s21 = smov 0   ;;  %s3140_s22 = smov 0  }
   0xc   :  { %s3142_s13 = smov 0   ;;  %s3144_s23 = smov 0  }
   0xd LB: > { %4064 = sst [smem:[#allocation8_spill]] %s3006_s15  ;;  %s2378_s24 = sadd.s32 4294967295, %s3042_s23   ;;  %s3042_s23 = sphi %s3144_s23, %s29_s23   ;;  %s3038_s13 = sphi %s3142_s13, %s4096_s13   ;;  %s3034_s22 = sphi %s3140_s22, %s4090_s22   ;;  %s3030_s21 = sphi %s3138_s21, %s4089_s21   ;;  %s3026_s20 = sphi %s3136_s20, %s4095_s20   ;;  %s3022_s19 = sphi %s3134_s19, %s4088_s19   ;;  %s3018_s18 = sphi %s3132_s18, %s4087_s18   ;;  %s3014_s17 = sphi %s3130_s17, %s4094_s17   ;;  %s3010_s16 = sphi %s3128_s16, %s4093_s16   ;;  %s3006_s15 = sphi %s3126_s15, %s4092_s15  }
   0xe   : > { %4065 = sst [smem:[#allocation9_spill]] %s3030_s21  ;;  %s2379_s25 = sadd.s32 4294967294, %s3042_s23  }
   0xf   : > { %4066 = sst [smem:[#allocation10_spill]] %s3034_s22  ;;  %s41_s26 = sadd.s32 1, %s3030_s21 }
  0x10   : > { %4067 = sst [smem:[#allocation11_spill]] %s3042_s23  ;;  %p42_p0 = scmp.ge.s32.totalorder %s41_s26, 3 }
  0x11   : > { %s44_s27 = sadd.s32 1, %s3034_s22  ;;  %s48_s28 = sadd.s32 1, %s3038_s13 }
  0x12   : > { %s353_s29 = smul.u32 %s3030_s21, %s3034_s22  ;;  %s4098_s26 = smov (%p42_p0, %s41_s26), 0 }
  0x13   : > { %4068 = sst [smem:[#allocation12_spill]] %s4098_s26  ;;  %s4100_s27 = smov (!%p42_p0, %s44_s27), %s3034_s22 }
  0x14   : > { %p370_p1 = scmp.ne.s32.totalorder %s3014_s17, %s3010_s16  ;;  %p371_p2 = scmp.eq.s32.totalorder %s2378_s24, 11 }
  0x15   : > { %p46_p3 = scmp.ge.s32.totalorder %s4100_s27, 2  ;;  %p376_p4 = scmp.ne.s32.totalorder %s3010_s16, %s3006_s15 }
  0x16   : > { %p3190_p5 = por %p371_p2, %p370_p1  ;;  %p377_p6 = scmp.eq.s32.totalorder %s2379_s25, 11 }
  0x17   : > { %s4102_s27 = smov (%p46_p3, %s4100_s27), 0  ;;  %s4104_s28 = smov (!%p46_p3, %s48_s28), %s3038_s13 }
  0x18   : > { %s4069_s30 = scalar_select %p3190_p5, 1, 0 }
  0x19   : > { %4071 = sst [smem:[#allocation14_spill]] %s4102_s27  ;;  %s354_s21 = smul.u32 %s4102_s27, %s4098_s26 }
  0x1a   : > { %4070 = sst [smem:[#allocation13_spill]] %s4069_s30  ;;  %p3199_p7 = por %p377_p6, %p376_p4 }
  0x1b   : > { %p50_p8 = scmp.ge.s32.totalorder %s4104_s28, 2  ;;  %p2382_p9 = scmp.ge.s32.totalorder %s3042_s23, 1 }
  0x1c   : > { %s4072_s14 = scalar_select %p3199_p7, 1, 0 }
  0x1d   : > { %s356_s24 = ssub.s32 %s353_s29, %s354_s21  ;;  %p447_p10 = scmp.lt.s32.totalorder %s3042_s23, 13 }
  0x1e   : > { %4073 = sst [smem:[#allocation15_spill]] %s4072_s14  ;;  %s4106_s28 = smov (%p50_p8, %s4104_s28), 0 }
  0x1f   : > { %4074 = sst [smem:[#allocation16_spill]] %s4106_s28  ;;  %p448_p11 = pnand %p2382_p9, %p447_p10 }
  0x20   : > { %s355_s22 = ssub.s32 %s3038_s13, %s4106_s28  ;;  %s360_s25 = sadd.s32 1, %s3014_s17 }
  0x21   : > { %s357_s15 = sor.u32 %s356_s24, %s355_s22  ;;  %451 = sbr.rel (%p448_p11) target bundleno = 1846 (0x736), region = 76 }
  0x22   : > { %p358_p12 = scmp.eq.s32.totalorder %s357_s15, 0  ;;  %s2383_s27 = sshll.u32 (!%p448_p11), %s3018_s18, 4 }
  0x23   : > { %p497_p13 = scmp.lt.s32.totalorder (!%p448_p11), %s3026_s20, 1  ;;  %p499_p0 = scmp.lt.s32.totalorder (!%p448_p11), %s2383_s27, 47 }
  0x24   : > { %s3211_s30 = scalar_select %p358_p12, %s3014_s17, %s360_s25  }
  0x25   : > { %s4075_s0 = sld [smem:[#allocation17_spill]] (!%p448_p11)  ;;  %p507_p1 = scmp.eq.s32.totalorder (!%p448_p11), %s3022_s19, 0 }
  0x26   : > { %s498_s26 = scalar_select %p497_p13, %s3026_s20, 1  ;;  %vm526_vm0 = vcmask 261120  }
  0x27   : > { %s4108_s27 = smov (!%p499_p0, %s2383_s27), 47  ;;  %p780_p2 = scmp.eq.s32.totalorder %s3018_s18, 0 }
  0x28   : > { %s2682_s21 = smul.u32 48, %s498_s26  ;;  %s4077_s1 = sld [smem:[#allocation18_spill]] }
  0x29   : > { %p3378_p3 = pnand %p780_p2, %p507_p1  ;;  %s4078_s2 = sld [smem:[#allocation19_spill]] }
  0x2a   : > { %s502_s29 = sadd.s32 %s2682_s21, %s4108_s27 }
  0x2b   : > { %s2384_s14 = sshll.u32 %s502_s29, 3 }
  0x2c   : > { %s3219_s22 = scalar_lea.vmem %s4075_s0, %s2384_s14  ;;  %s4057_s14 = sand.u32 1, %s3010_s16  }
  0x2d   : > { %v508_v1 = vld [vmem:[%s3219_s22] sm:$0xff]  ;;  %v510_v2 = vld [vmem:[%s3219_s22 + $0x10] sm:$0xff]  ;;  %v509_v3 = vld [vmem:[%s3219_s22 + $0x8] sm:$0xff]  ;;  %s3474_s24 = scalar_lea.vmem [#allocation5], %s4057_s14 }
  0x2e   : > { %v527_v4 = vsel %vm526_vm0, %v508_v1, 0.0  ;;  %v533_v5 = vsel %vm526_vm0, %v510_v2, 0.0  ;;  %v511_v6 = vld [vmem:[%s3219_s22 + $0x18] sm:$0xff]  ;;  %v530_v7 = vsel %vm526_vm0, %v509_v3, 0.0  ;;  %v512_v9 = vld [vmem:[%s3219_s22 + $0x20] sm:$0xff]  ;;  %v513_v10 = vld [vmem:[%s3219_s22 + $0x28] sm:$0xff] }
  0x2f   : > { %528 = vadd.xlane.f32.xlu0 %v527_v4  ;;  %534 = vadd.xlane.f32.xlu1 %v533_v5  ;;  %v536_v8 = vsel %vm526_vm0, %v511_v6, 0.0  ;;  %v539_v11 = vsel %vm526_vm0, %v512_v9, 0.0  ;;  %v542_v12 = vsel %vm526_vm0, %v513_v10, 0.0  ;;  %v3234_v13 = vld [vmem:[%s3219_s22 + $0x30] sm:$0xff]  ;;  %v3237_v14 = vld [vmem:[%s3219_s22 + $0x38] sm:$0xff]  ;;  %v3244_v17 = vld [vmem:[%s3219_s22 + $0x40] sm:$0xff] }
  0x30   : > { %v545_v15 = vsel %vm526_vm0, %v3234_v13, 0.0  ;;  %v548_v16 = vsel %vm526_vm0, %v3237_v14, 0.0  ;;  %v3247_v18 = vld [vmem:[%s3219_s22 + $0x48] sm:$0xff]  ;;  %v551_v19 = vsel %vm526_vm0, %v3244_v17, 0.0  ;;  %v3254_v21 = vld [vmem:[%s3219_s22 + $0x50] sm:$0xff]  ;;  %v3257_v22 = vld [vmem:[%s3219_s22 + $0x58] sm:$0xff] }
  0x31   : > { %v554_v20 = vsel %vm526_vm0, %v3247_v18, 0.0  ;;  %v557_v23 = vsel %vm526_vm0, %v3254_v21, 0.0  ;;  %v560_v24 = vsel %vm526_vm0, %v3257_v22, 0.0  ;;  %v3264_v25 = vld [vmem:[%s3219_s22 + $0x60] sm:$0xff]  ;;  %v3267_v26 = vld [vmem:[%s3219_s22 + $0x68] sm:$0xff]  ;;  %v3274_v29 = vld [vmem:[%s3219_s22 + $0x70] sm:$0xff] }
  0x32   : > { %v563_v27 = vsel %vm526_vm0, %v3264_v25, 0.0  ;;  %v566_v28 = vsel %vm526_vm0, %v3267_v26, 0.0  ;;  %v3277_v30 = vld [vmem:[%s3219_s22 + $0x78] sm:$0xff]  ;;  %v569_v31 = vsel %vm526_vm0, %v3274_v29, 0.0 }
  0x33   : > { %531 = vadd.xlane.f32.xlu0 %v530_v7  ;;  %537 = vadd.xlane.f32.xlu1 %v536_v8  ;;  %v572_v32 = vsel %vm526_vm0, %v3277_v30, 0.0 }
  0x37   : > { %540 = vadd.xlane.f32.xlu0 %v539_v11  ;;  %543 = vadd.xlane.f32.xlu1 %v542_v12 }
  0x3b   : > { %546 = vadd.xlane.f32.xlu0 %v545_v15  ;;  %549 = vadd.xlane.f32.xlu1 %v548_v16 }
  0x3f   : > { %552 = vadd.xlane.f32.xlu0 %v551_v19  ;;  %555 = vadd.xlane.f32.xlu1 %v554_v20 }
  0x43   : > { %558 = vadd.xlane.f32.xlu0 %v557_v23  ;;  %561 = vadd.xlane.f32.xlu1 %v560_v24 }
  0x47   : > { %564 = vadd.xlane.f32.xlu0 %v563_v27  ;;  %567 = vadd.xlane.f32.xlu1 %v566_v28 }
  0x4b   : > { %570 = vadd.xlane.f32.xlu0 %v569_v31  ;;  %573 = vadd.xlane.f32.xlu1 %v572_v32 }
  0xb8   : > { %v529_v33 = vpop.xlane.xlu0 %528  ;;  %v535_v34 = vpop.xlane.xlu1 %534 }
  0xb9   : > { %v576_v35 = vmul.f32 0.03125, %v529_v33  ;;  %v578_v36 = vmul.f32 0.03125, %v535_v34 }
  0xbb   : > { %v3283_v37 = vsub.f32 %v508_v1, %v576_v35  ;;  %v3285_v38 = vsub.f32 %v510_v2, %v578_v36 }
  0xbc   : > { %v532_v39 = vpop.xlane.xlu0 %531  ;;  %v538_v40 = vpop.xlane.xlu1 %537 }
  0xbd   : > { %v577_v41 = vmul.f32 0.03125, %v532_v39  ;;  %v579_v42 = vmul.f32 0.03125, %v538_v40  ;;  %v608_v43 = vmul.f32 %v3283_v37, %v3283_v37  ;;  %v610_v44 = vmul.f32 %v3285_v38, %v3285_v38 }
  0xbf   : > { %v3291_v45 = vsub.f32 %v509_v3, %v577_v41  ;;  %v3293_v46 = vsub.f32 %v511_v6, %v579_v42  ;;  %v624_v47 = vsel %vm526_vm0, %v608_v43, 0.0  ;;  %v630_v50 = vsel %vm526_vm0, %v610_v44, 0.0 }
  0xc0   : > { %625 = vadd.xlane.f32.xlu0 %v624_v47  ;;  %v541_v48 = vpop.xlane.xlu0 %540  ;;  %v544_v49 = vpop.xlane.xlu1 %543 }
  0xc1   : > { %v580_v51 = vmul.f32 0.03125, %v541_v48  ;;  %v581_v52 = vmul.f32 0.03125, %v544_v49  ;;  %v609_v53 = vmul.f32 %v3291_v45, %v3291_v45  ;;  %v611_v54 = vmul.f32 %v3293_v46, %v3293_v46 }
  0xc3   : > { %v3301_v55 = vsub.f32 %v512_v9, %v580_v51  ;;  %v3303_v56 = vsub.f32 %v513_v10, %v581_v52  ;;  %v627_v57 = vsel %vm526_vm0, %v609_v53, 0.0  ;;  %v633_v60 = vsel %vm526_vm0, %v611_v54, 0.0 }
  0xc4   : > { %631 = vadd.xlane.f32.xlu0 %v630_v50  ;;  %628 = vadd.xlane.f32.xlu1 %v627_v57  ;;  %v547_v58 = vpop.xlane.xlu0 %546  ;;  %v550_v59 = vpop.xlane.xlu1 %549 }
  0xc5   : > { %v582_v61 = vmul.f32 0.03125, %v547_v58  ;;  %v583_v62 = vmul.f32 0.03125, %v550_v59  ;;  %v612_v63 = vmul.f32 %v3301_v55, %v3301_v55  ;;  %v613_v0 = vmul.f32 %v3303_v56, %v3303_v56 }
  0xc7   : > { %v3312_v1 = vsub.f32 %v3234_v13, %v582_v61  ;;  %v3315_v2 = vsub.f32 %v3237_v14, %v583_v62  ;;  %v636_v3 = vsel %vm526_vm0, %v612_v63, 0.0  ;;  %v639_v6 = vsel %vm526_vm0, %v613_v0, 0.0 }
  0xc8   : > { %634 = vadd.xlane.f32.xlu1 %v633_v60  ;;  %637 = vadd.xlane.f32.xlu0 %v636_v3  ;;  %v553_v4 = vpop.xlane.xlu0 %552  ;;  %v556_v5 = vpop.xlane.xlu1 %555 }
  0xc9   : > { %v584_v7 = vmul.f32 0.03125, %v553_v4  ;;  %v585_v8 = vmul.f32 0.03125, %v556_v5  ;;  %v614_v9 = vmul.f32 %v3312_v1, %v3312_v1  ;;  %v615_v10 = vmul.f32 %v3315_v2, %v3315_v2 }
  0xcb   : > { %v3324_v11 = vsub.f32 %v3244_v17, %v584_v7  ;;  %v3327_v12 = vsub.f32 %v3247_v18, %v585_v8  ;;  %v642_v13 = vsel %vm526_vm0, %v614_v9, 0.0  ;;  %v645_v16 = vsel %vm526_vm0, %v615_v10, 0.0 }
  0xcc   : > { %640 = vadd.xlane.f32.xlu1 %v639_v6  ;;  %643 = vadd.xlane.f32.xlu0 %v642_v13  ;;  %v559_v14 = vpop.xlane.xlu0 %558  ;;  %v562_v15 = vpop.xlane.xlu1 %561 }
  0xcd   : > { %v586_v19 = vmul.f32 0.03125, %v559_v14  ;;  %v587_v20 = vmul.f32 0.03125, %v562_v15  ;;  %v616_v23 = vmul.f32 %v3324_v11, %v3324_v11  ;;  %v617_v17 = vmul.f32 %v3327_v12, %v3327_v12 }
  0xcf   : > { %v3336_v24 = vsub.f32 %v3254_v21, %v586_v19  ;;  %v3339_v18 = vsub.f32 %v3257_v22, %v587_v20  ;;  %v648_v27 = vsel %vm526_vm0, %v616_v23, 0.0  ;;  %v651_v32 = vsel %vm526_vm0, %v617_v17, 0.0 }
  0xd0   : > { %646 = vadd.xlane.f32.xlu1 %v645_v16  ;;  %649 = vadd.xlane.f32.xlu0 %v648_v27  ;;  %v565_v28 = vpop.xlane.xlu0 %564  ;;  %v568_v31 = vpop.xlane.xlu1 %567  ;;  %v3385_v27 = vld [vmem:[%s4077_s1] ss:$0 sm:$0xff] }
  0xd1   : > { %v588_v33 = vmul.f32 0.03125, %v565_v28  ;;  %v589_v34 = vmul.f32 0.03125, %v568_v31  ;;  %v618_v35 = vmul.f32 %v3336_v24, %v3336_v24  ;;  %v619_v21 = vmul.f32 %v3339_v18, %v3339_v18 }
  0xd3   : > { %v3348_v36 = vsub.f32 %v3264_v25, %v588_v33  ;;  %v3351_v22 = vsub.f32 %v3267_v26, %v589_v34  ;;  %v654_v39 = vsel %vm526_vm0, %v618_v35, 0.0  ;;  %v657_v42 = vsel %vm526_vm0, %v619_v21, 0.0  ;;  %v3391_v33 = vld [vmem:[%s4078_s2] ss:$0 sm:$0xff] }
  0xd4   : > { %652 = vadd.xlane.f32.xlu1 %v651_v32  ;;  %655 = vadd.xlane.f32.xlu0 %v654_v39  ;;  %v571_v40 = vpop.xlane.xlu0 %570  ;;  %v574_v41 = vpop.xlane.xlu1 %573 }
  0xd5   : > { %v590_v43 = vmul.f32 0.03125, %v571_v40  ;;  %v591_v44 = vmul.f32 0.03125, %v574_v41  ;;  %v620_v47 = vmul.f32 %v3348_v36, %v3348_v36  ;;  %v621_v25 = vmul.f32 %v3351_v22, %v3351_v22 }
  0xd7   : > { %v3360_v26 = vsub.f32 %v3274_v29, %v590_v43  ;;  %v3363_v48 = vsub.f32 %v3277_v30, %v591_v44  ;;  %v660_v49 = vsel %vm526_vm0, %v620_v47, 0.0  ;;  %v663_v50 = vsel %vm526_vm0, %v621_v25, 0.0 }
  0xd8   : > { %658 = vadd.xlane.f32.xlu1 %v657_v42  ;;  %661 = vadd.xlane.f32.xlu0 %v660_v49 }
  0xd9   : > { %v622_v51 = vmul.f32 %v3360_v26, %v3360_v26  ;;  %v623_v52 = vmul.f32 %v3363_v48, %v3363_v48 }
  0xdb   : > { %v666_v53 = vsel %vm526_vm0, %v622_v51, 0.0  ;;  %v669_v29 = vsel %vm526_vm0, %v623_v52, 0.0 }
  0xdc   : > { %664 = vadd.xlane.f32.xlu1 %v663_v50  ;;  %667 = vadd.xlane.f32.xlu0 %v666_v53 }
  0xe0   : > { %670 = vadd.xlane.f32.xlu1 %v669_v29 }
 0x149   : > { %v626_v30 = vpop.xlane.xlu0 %625 }
 0x14a   : > { %v672_v54 = vmul.f32 0.03125, %v626_v30 }
 0x14c   : > { %v688_v57 = vadd.f32 1e-05, %v672_v54 }
 0x14d   : > { %v629_v58 = vpop.xlane.xlu1 %628  ;;  %v632_v59 = vpop.xlane.xlu0 %631 }
 0x14e   : > { %2774 = vrsqrt.f32 %v688_v57  ;;  %v673_v60 = vmul.f32 0.03125, %v629_v58  ;;  %v674_v61 = vmul.f32 0.03125, %v632_v59 }
 0x150   : > { %v689_v62 = vadd.f32 1e-05, %v673_v60  ;;  %v690_v63 = vadd.f32 1e-05, %v674_v61 }
 0x151   : > { %v635_v0 = vpop.xlane.xlu1 %634  ;;  %v638_v3 = vpop.xlane.xlu0 %637 }
 0x152   : > { %2776 = vrsqrt.f32 %v689_v62  ;;  %v675_v4 = vmul.f32 0.03125, %v635_v0  ;;  %v676_v5 = vmul.f32 0.03125, %v638_v3 }
 0x153   : > { %2778 = vrsqrt.f32 %v690_v63 }
 0x154   : > { %v691_v6 = vadd.f32 1e-05, %v675_v4  ;;  %v692_v7 = vadd.f32 1e-05, %v676_v5 }
 0x155   : > { %v641_v8 = vpop.xlane.xlu1 %640  ;;  %v644_v9 = vpop.xlane.xlu0 %643 }
 0x156   : > { %2780 = vrsqrt.f32 %v691_v6  ;;  %v677_v10 = vmul.f32 0.03125, %v641_v8  ;;  %v678_v13 = vmul.f32 0.03125, %v644_v9 }
 0x157   : > { %2782 = vrsqrt.f32 %v692_v7 }
 0x158   : > { %v693_v14 = vadd.f32 1e-05, %v677_v10  ;;  %v694_v15 = vadd.f32 1e-05, %v678_v13 }
 0x159   : > { %v647_v16 = vpop.xlane.xlu1 %646  ;;  %v650_v19 = vpop.xlane.xlu0 %649 }
 0x15a   : > { %2784 = vrsqrt.f32 %v693_v14  ;;  %v679_v20 = vmul.f32 0.03125, %v647_v16  ;;  %v680_v23 = vmul.f32 0.03125, %v650_v19 }
 0x15b   : > { %v2775_v17 = vpop.eup %2774  ;;  %2786 = vrsqrt.f32 %v694_v15 }
 0x15c   : > { %v720_v28 = vmul.f32 %v2775_v17, %v3283_v37  ;;  %v695_v31 = vadd.f32 1e-05, %v679_v20  ;;  %v696_v32 = vadd.f32 1e-05, %v680_v23 }
 0x15d   : > { %v653_v34 = vpop.xlane.xlu1 %652  ;;  %v656_v35 = vpop.xlane.xlu0 %655 }
 0x15e   : > { %v742_v21 = vmul.f32 %v3385_v27, %v720_v28  ;;  %2788 = vrsqrt.f32 %v695_v31  ;;  %v681_v39 = vmul.f32 0.03125, %v653_v34  ;;  %v682_v40 = vmul.f32 0.03125, %v656_v35 }
 0x15f   : > { %v2777_v41 = vpop.eup %2776  ;;  %2790 = vrsqrt.f32 %v696_v32 }
 0x160   : > { %v2779_v42 = vpop.eup %2778  ;;  %v3395_v43 = vadd.f32 %v3391_v33, %v742_v21  ;;  %v721_v37 = vmul.f32 %v2777_v41, %v3291_v45  ;;  %v697_v44 = vadd.f32 1e-05, %v681_v39  ;;  %v698_v47 = vadd.f32 1e-05, %v682_v40 }
 0x161   : > { %v722_v25 = vmul.f32 %v2779_v42, %v3285_v38  ;;  %v659_v49 = vpop.xlane.xlu1 %658  ;;  %v662_v50 = vpop.xlane.xlu0 %661 }
 0x162   : > { %v743_v51 = vmul.f32 %v3385_v27, %v721_v37  ;;  %2792 = vrsqrt.f32 %v697_v44  ;;  %v683_v52 = vmul.f32 0.03125, %v659_v49  ;;  %v684_v53 = vmul.f32 0.03125, %v662_v50 }
 0x163   : > { %v2781_v29 = vpop.eup %2780  ;;  %v744_v30 = vmul.f32 %v3385_v27, %v722_v25  ;;  %2794 = vrsqrt.f32 %v698_v47 }
 0x164   : > { %v2783_v54 = vpop.eup %2782  ;;  %v3402_v57 = vadd.f32 %v3391_v33, %v743_v51  ;;  %v723_v45 = vmul.f32 %v2781_v29, %v3293_v46  ;;  %v699_v58 = vadd.f32 1e-05, %v683_v52  ;;  %v700_v59 = vadd.f32 1e-05, %v684_v53 }
 0x165   : > { %v3406_v38 = vadd.f32 %v3391_v33, %v744_v30  ;;  %v724_v60 = vmul.f32 %v2783_v54, %v3301_v55  ;;  %v665_v61 = vpop.xlane.xlu1 %664  ;;  %v668_v62 = vpop.xlane.xlu0 %667 }
 0x166   : > { %v745_v63 = vmul.f32 %v3385_v27, %v723_v45  ;;  %2796 = vrsqrt.f32 %v699_v58  ;;  %v685_v0 = vmul.f32 0.03125, %v665_v61  ;;  %v686_v3 = vmul.f32 0.03125, %v668_v62 }
 0x167   : > { %v2785_v4 = vpop.eup %2784  ;;  %v746_v5 = vmul.f32 %v3385_v27, %v724_v60  ;;  %2798 = vrsqrt.f32 %v700_v59 }
 0x168   : > { %v2787_v6 = vpop.eup %2786  ;;  %v3412_v46 = vadd.f32 %v3391_v33, %v745_v63  ;;  %v725_v7 = vmul.f32 %v2785_v4, %v3303_v56  ;;  %v701_v8 = vadd.f32 1e-05, %v685_v0  ;;  %v702_v9 = vadd.f32 1e-05, %v686_v3 }
 0x169   : > { %v3416_v55 = vadd.f32 %v3391_v33, %v746_v5  ;;  %v726_v10 = vmul.f32 %v2787_v6, %v3312_v1  ;;  %v671_v13 = vpop.xlane.xlu1 %670 }
 0x16a   : > { %v747_v14 = vmul.f32 %v3385_v27, %v725_v7  ;;  %2800 = vrsqrt.f32 %v701_v8  ;;  %v687_v15 = vmul.f32 0.03125, %v671_v13 }
 0x16b   : > { %v2789_v16 = vpop.eup %2788  ;;  %v748_v19 = vmul.f32 %v3385_v27, %v726_v10  ;;  %2802 = vrsqrt.f32 %v702_v9 }
 0x16c   : > { %v2791_v20 = vpop.eup %2790  ;;  %v3422_v23 = vadd.f32 %v3391_v33, %v747_v14  ;;  %v727_v56 = vmul.f32 %v2789_v16, %v3315_v2  ;;  %v703_v17 = vadd.f32 1e-05, %v687_v15 }
 0x16d   : > { %v3426_v28 = vadd.f32 %v3391_v33, %v748_v19  ;;  %v728_v1 = vmul.f32 %v2791_v20, %v3324_v11 }
 0x16e   : > { %v749_v31 = vmul.f32 %v3385_v27, %v727_v56  ;;  %2804 = vrsqrt.f32 %v703_v17 }
 0x16f   : > { %v2793_v32 = vpop.eup %2792  ;;  %v750_v34 = vmul.f32 %v3385_v27, %v728_v1 }
 0x170   : > { %v2795_v35 = vpop.eup %2794  ;;  %v3432_v21 = vadd.f32 %v3391_v33, %v749_v31  ;;  %v729_v39 = vmul.f32 %v2793_v32, %v3327_v12 }
 0x171   : > { %v3436_v2 = vadd.f32 %v3391_v33, %v750_v34  ;;  %v730_v40 = vmul.f32 %v2795_v35, %v3336_v24 }
 0x172   : > { %v751_v41 = vmul.f32 %v3385_v27, %v729_v39 }
 0x173   : > { %v2797_v11 = vpop.eup %2796  ;;  %v752_v42 = vmul.f32 %v3385_v27, %v730_v40 }
 0x174   : > { %v2799_v37 = vpop.eup %2798  ;;  %v3442_v44 = vadd.f32 %v3391_v33, %v751_v41  ;;  %v731_v47 = vmul.f32 %v2797_v11, %v3339_v18 }
 0x175   : > { %v3446_v25 = vadd.f32 %v3391_v33, %v752_v42  ;;  %v732_v12 = vmul.f32 %v2799_v37, %v3348_v36 }
 0x176   : > { %v753_v49 = vmul.f32 %v3385_v27, %v731_v47 }
 0x177   : > { %v2801_v24 = vpop.eup %2800  ;;  %v754_v50 = vmul.f32 %v3385_v27, %v732_v12 }
 0x178   : > { %v2803_v51 = vpop.eup %2802  ;;  %v3452_v52 = vadd.f32 %v3391_v33, %v753_v49  ;;  %v733_v53 = vmul.f32 %v2801_v24, %v3351_v22 }
 0x179   : > { %v3456_v29 = vadd.f32 %v3391_v33, %v754_v50  ;;  %v734_v18 = vmul.f32 %v2803_v51, %v3360_v26 }
 0x17a   : > { %v755_v30 = vmul.f32 %v3385_v27, %v733_v53 }
 0x17b   : > { %v2805_v36 = vpop.eup %2804  ;;  %v756_v54 = vmul.f32 %v3385_v27, %v734_v18 }
 0x17c   : > { %v3462_v45 = vadd.f32 %v3391_v33, %v755_v30  ;;  %v735_v58 = vmul.f32 %v2805_v36, %v3363_v48  ;;  %784 = sbr.rel (%p3378_p3) target bundleno = 387 (0x183), region = 80 }
 0x17d   : > { %v3466_v59 = vadd.f32 %v3391_v33, %v756_v54 }
 0x17e   : > { %v757_v22 = vmul.f32 %v3385_v27, %v735_v58 }
 0x180   : > { %v3470_v60 = vadd.f32 %v3391_v33, %v757_v22 }
 0x181   : > { %vm785_vm1 = vcmask 122880   ;;  %v3044_v26 = vmov 0.0  }
 0x182   : > { %786 = vst.msk [vmem:[#allocation2] sm:$0x1] %vm785_vm1, %v3044_v26 }
 0x183 PF: > { %p2387_p4 = scmp.ne.s32.totalorder %s3022_s19, 0 }
 0x184   : > { %s2405_s21 = sshll.u32 (!%p2387_p4), %s3018_s18, 7 }
 0x185   : > { %789 = sbr.rel (%p2387_p4) target bundleno = 669 (0x29d), region = 84 }
 0x18a   : > { %v793_v48 = vld [vmem:[%s4035_s5 + $0x18] sm:$0xff]  ;;  %v792_v27 = vld [vmem:[%s4035_s5 + $0x10] sm:$0xff]  ;;  %2551 = vmatprep.mubr.msk.f32.mxu0 %vm526_vm0, %v3395_v43  ;;  %2563 = vmatprep.mubr.msk.f32.mxu1 %vm526_vm0, %v3436_v2  ;;  %v791_v33 = vld [vmem:[%s4035_s5 + $0x8] sm:$0xff]  ;;  %v1075_v63 = vlaneseq  ;;  %v3544_v17 = vstv %s2405_s21  ;;  %vm1174_vm3 = vcmask 130048  }
 0x18b   : > { %2543 = vmatprep.subr.mxu0 %v793_v48  ;;  %2670 = vmatprep.subr.mxu1 %v793_v48  ;;  %v790_v61 = vld [vmem:[%s4035_s5] sm:$0xff] }
 0x18c   : > { %2544 = vmatpush3.msra.mxu0 %v793_v48  ;;  %2674 = vmatpush3.msra.mxu1 %v793_v48  ;;  %v3526_v62 = vld [vmem:[%s4036_s6] ss:$0 sm:$0xff]  ;;  %v3532_v8 = vshrl.u32 %v1075_v63, 7 }
 0x18d   : > { %2545 = vmatprep.subr.mxu0 %v792_v27  ;;  %2671 = vmatprep.subr.mxu1 %v792_v27 }
 0x18e   : > { %2546 = vmatpush3.msra.mxu0 %v792_v27  ;;  %2675 = vmatpush3.msra.mxu1 %v792_v27  ;;  %v1077_v20 = vadd.s32 8, %v3532_v8  ;;  %v1085_v34 = vadd.s32 72, %v3532_v8  ;;  %v1079_v37 = vadd.s32 24, %v3532_v8  ;;  %v1084_v49 = vadd.s32 64, %v3532_v8 }
 0x18f   : > { %2547 = vmatprep.subr.mxu0 %v791_v33  ;;  %2672 = vmatprep.subr.mxu1 %v791_v33  ;;  %v1093_v53 = vadd.s32 %v3544_v17, %v3532_v8  ;;  %v1087_v36 = vadd.s32 88, %v3532_v8 }
 0x190   : > { %2548 = vmatpush3.msra.mxu0 %v791_v33  ;;  %2676 = vmatpush3.msra.mxu1 %v791_v33  ;;  %v3558_v42 = vadd.s32 %v3544_v17, %v1077_v20  ;;  %v3570_v51 = vadd.s32 %v3544_v17, %v1085_v34  ;;  %v3585_v48 = vadd.s32 %v3544_v17, %v1079_v37  ;;  %v1078_v33 = vadd.s32 16, %v3532_v8 }
 0x191   : > { %2549 = vmatprep.subr.mxu0 %v790_v61  ;;  %2673 = vmatprep.subr.mxu1 %v790_v61  ;;  %v3593_v63 = vadd.s32 %v3544_v17, %v1084_v49  ;;  %vm1109_vm4 = vcmp.lt.s32.totalorder %v1093_v53, 300  ;;  %v1081_v34 = vadd.s32 40, %v3532_v8 }
 0x192   : > { %2550 = vmatpush3.msra.mxu0 %v790_v61  ;;  %2677 = vmatpush3.msra.mxu1 %v790_v61  ;;  %vm1110_vm2 = vcmp.lt.s32.totalorder %v3558_v42, 300  ;;  %vm1112_vm5 = vcmp.lt.s32.totalorder %v3585_v48, 300  ;;  %v1095_v20 = vadd.s32 %v3544_v17, %v1078_v33  ;;  %vm1118_vm9 = vcmp.lt.s32.totalorder %v3570_v51, 300 }
 0x193   : > { %2552 = vmatmul.mubr.msk.f32.vlgmr.msra.gmra.mxu0 %vm526_vm0, %v3402_v57  ;;  %2564 = vmatmul.mubr.msk.f32.vlgmr.msra.gmra.mxu1 %vm526_vm0, %v3442_v44  ;;  %vm1117_vm12 = vcmp.lt.s32.totalorder %v3593_v63, 300 }
 0x194   : > { %2554 = vmatprep.mubr.msk.f32.mxu0 %vm526_vm0, %v3406_v38  ;;  %2566 = vmatprep.mubr.msk.f32.mxu1 %vm526_vm0, %v3446_v25  ;;  %vm1111_vm6 = vcmp.lt.s32.totalorder %v1095_v20, 300 }
 0x197   : > { %2555 = vmatmul.mubr.msk.f32.gmra.mxu0 %vm526_vm0, %v3412_v46  ;;  %2567 = vmatmul.mubr.msk.f32.gmra.mxu1 %vm526_vm0, %v3452_v52 }
 0x198   : > { %2557 = vmatprep.mubr.msk.f32.mxu0 %vm526_vm0, %v3416_v55  ;;  %2569 = vmatprep.mubr.msk.f32.mxu1 %vm526_vm0, %v3456_v29 }
 0x19b   : > { %2558 = vmatmul.mubr.msk.f32.gmra.mxu0 %vm526_vm0, %v3422_v23  ;;  %2570 = vmatmul.mubr.msk.f32.gmra.mxu1 %vm526_vm0, %v3462_v45 }
 0x19c   : > { %2560 = vmatprep.mubr.msk.f32.mxu0 %vm526_vm0, %v3426_v28  ;;  %2572 = vmatprep.mubr.msk.f32.mxu1 %vm526_vm0, %v3466_v59 }
 0x19f   : > { %2561 = vmatmul.mubr.msk.f32.gmra.mxu0 %vm526_vm0, %v3432_v21  ;;  %2573 = vmatmul.mubr.msk.f32.gmra.mxu1 %vm526_vm0, %v3470_v60 }
 0x253   : > { %v2553_v0 = vpop.f32.mrf.mxu0  ;;  %v2565_v3 = vpop.f32.mrf.mxu1 }
 0x254   : > { %v3529_v4 = vadd.f32 %v2553_v0, %v3526_v62  ;;  %v3563_v12 = vadd.f32 %v2565_v3, %v3526_v62  ;;  %v1086_v3 = vadd.s32 80, %v3532_v8 }
 0x255   : > { %v915_v5 = vpop.f32.mrf.mxu0  ;;  %v955_v6 = vpop.f32.mrf.mxu1 }
 0x256   : > { %v1011_v7 = vmul.f32 0.70710677, %v3529_v4  ;;  %v3535_v9 = vadd.f32 %v3526_v62, %v915_v5  ;;  %v3551_v35 = vadd.f32 %v3526_v62, %v955_v6  ;;  %v1019_v61 = vmul.f32 0.70710677, %v3563_v12 }
 0x257   : > { %v2556_v10 = vpop.f32.mrf.mxu0  ;;  %v2568_v13 = vpop.f32.mrf.mxu1 }
 0x258   : > { %2806 = verf.f32 %v1011_v7  ;;  %v3539_v14 = vadd.f32 %v2556_v10, %v3526_v62  ;;  %v1010_v15 = vmul.f32 0.70710677, %v3535_v9  ;;  %v1018_v18 = vmul.f32 0.70710677, %v3551_v35 }
 0x259   : > { %v925_v16 = vpop.f32.mrf.mxu0  ;;  %v965_v19 = vpop.f32.mrf.mxu1  ;;  %v3588_v27 = vadd.f32 %v2568_v13, %v3526_v62  ;;  %v3604_v10 = vadd.s32 %v3544_v17, %v1087_v36 }
 0x25a   : > { %v1013_v56 = vmul.f32 0.70710677, %v3539_v14  ;;  %2808 = verf.f32 %v1010_v15  ;;  %v3547_v1 = vadd.f32 %v3526_v62, %v925_v16  ;;  %v3580_v54 = vadd.f32 %v3526_v62, %v965_v19 }
 0x25b   : > { %v2559_v31 = vpop.f32.mrf.mxu0  ;;  %v2571_v32 = vpop.f32.mrf.mxu1  ;;  %v1021_v19 = vmul.f32 0.70710677, %v3588_v27  ;;  %v997_v36 = vmul.f32 0.5, %v3539_v14  ;;  %vm1120_vm13 = vcmp.lt.s32.totalorder %v3604_v10, 300 }
 0x25c   : > { %v3554_v39 = vadd.f32 %v2559_v31, %v3526_v62  ;;  %2810 = verf.f32 %v1013_v56  ;;  %v1012_v40 = vmul.f32 0.70710677, %v3547_v1  ;;  %v1020_v13 = vmul.f32 0.70710677, %v3580_v54 }
 0x25d   : > { %v935_v41 = vpop.f32.mrf.mxu0  ;;  %v975_v11 = vpop.f32.mrf.mxu1  ;;  %v995_v31 = vmul.f32 0.5, %v3529_v4 }
 0x25e   : > { %v1015_v47 = vmul.f32 0.70710677, %v3554_v39  ;;  %2812 = verf.f32 %v1012_v40  ;;  %v3567_v24 = vadd.f32 %v3526_v62, %v935_v41  ;;  %v3598_v5 = vadd.f32 %v3526_v62, %v975_v11 }
 0x25f   : > { %v2562_v50 = vpop.f32.mrf.mxu0  ;;  %v2574_v22 = vpop.f32.mrf.mxu1  ;;  %v3614_v40 = vadd.f32 %v2571_v32, %v3526_v62  ;;  %v3617_v11 = vadd.s32 %v3544_v17, %v1086_v3  ;;  %v1080_v32 = vadd.s32 32, %v3532_v8  ;;  %v996_v3 = vmul.f32 0.5, %v3547_v1 }
 0x260   : > { %v3576_v30 = vadd.f32 %v2562_v50, %v3526_v62  ;;  %2814 = verf.f32 %v1015_v47  ;;  %v1014_v58 = vmul.f32 0.70710677, %v3567_v24  ;;  %v1022_v37 = vmul.f32 0.70710677, %v3598_v5 }
 0x261   : > { %v945_v26 = vpop.f32.mrf.mxu0  ;;  %v985_v15 = vpop.f32.mrf.mxu1  ;;  %v994_v50 = vmul.f32 0.5, %v3535_v9  ;;  %v1023_v33 = vmul.f32 0.70710677, %v3614_v40  ;;  %v1098_v9 = vadd.s32 %v3544_v17, %v1081_v34  ;;  %v1082_v1 = vadd.s32 48, %v3532_v8 }
 0x262   : > { %2816 = verf.f32 %v1014_v58  ;;  %v1017_v0 = vmul.f32 0.70710677, %v3576_v30  ;;  %v3601_v6 = vadd.f32 %v3526_v62, %v945_v26  ;;  %v3621_v47 = vadd.f32 %v3526_v62, %v985_v15 }
 0x263   : > { %2818 = verf.f32 %v1018_v18  ;;  %v999_v34 = vmul.f32 0.5, %v3554_v39  ;;  %vm1114_vm7 = vcmp.lt.s32.totalorder %v1098_v9, 300  ;;  %v1001_v20 = vmul.f32 0.5, %v3576_v30 }
 0x264   : > { %2820 = verf.f32 %v1017_v0  ;;  %v1016_v56 = vmul.f32 0.70710677, %v3601_v6  ;;  %vm1119_vm14 = vcmp.lt.s32.totalorder %v3617_v11, 300 }
 0x265   : > { %v2807_v7 = vpop.eup %2806  ;;  %2822 = verf.f32 %v1019_v61  ;;  %v3628_v61 = vadd.f32 %v2574_v22, %v3526_v62  ;;  %v1097_v62 = vadd.s32 %v3544_v17, %v1080_v32  ;;  %v1083_v22 = vadd.s32 56, %v3532_v8 }
 0x266   : > { %v1043_v16 = vadd.f32 1.0, %v2807_v7  ;;  %2824 = verf.f32 %v1016_v56  ;;  %v1024_v7 = vmul.f32 0.70710677, %v3621_v47 }
 0x267   : > { %v2809_v41 = vpop.eup %2808  ;;  %2826 = verf.f32 %v1020_v13  ;;  %v1025_v42 = vmul.f32 0.70710677, %v3628_v61  ;;  %vm1113_vm8 = vcmp.lt.s32.totalorder %v1097_v62, 300  ;;  %v1003_v62 = vmul.f32 0.5, %v3563_v12 }
 0x268   : > { %v1059_v49 = vmul.f32 %v1043_v16, %v995_v31  ;;  %v1042_v4 = vadd.f32 1.0, %v2809_v41  ;;  %2828 = verf.f32 %v1021_v19 }
 0x269   : > { %v2811_v18 = vpop.eup %2810  ;;  %2830 = verf.f32 %v1022_v37 }
 0x26a   : > { %v1058_v58 = vmul.f32 %v1042_v4, %v994_v50  ;;  %v1045_v26 = vadd.f32 1.0, %v2811_v18  ;;  %v1158_v14 = vsel %vm1110_vm2, %v1059_v49, 0.0  ;;  %2832 = verf.f32 %v1023_v33 }
 0x26b   : > { %v2813_v0 = vpop.eup %2812  ;;  %v1176_v53 = vsel %vm1174_vm3, %v1158_v14, 0.0  ;;  %v998_v49 = vmul.f32 0.5, %v3567_v24  ;;  %2834 = verf.f32 %v1024_v7  ;;  %v1099_v14 = vadd.s32 %v3544_v17, %v1082_v1 }
 0x26c   : > { %v1157_v13 = vsel %vm1109_vm4, %v1058_v58, 0.0  ;;  %v1061_v15 = vmul.f32 %v1045_v26, %v997_v36  ;;  %v1044_v16 = vadd.f32 1.0, %v2813_v0  ;;  %2836 = verf.f32 %v1025_v42 }
 0x26d   : > { %v2815_v19 = vpop.eup %2814  ;;  %v1175_v56 = vsel %vm1174_vm3, %v1157_v13, 0.0  ;;  %vm1115_vm11 = vcmp.lt.s32.totalorder %v1099_v14, 300  ;;  %v1006_v14 = vmul.f32 0.5, %v3598_v5 }
 0x26e   : > { %v1060_v31 = vmul.f32 %v1044_v16, %v996_v3  ;;  %v1047_v37 = vadd.f32 1.0, %v2815_v19  ;;  %v1177_v4 = vadd.f32 %v1176_v53, %v1175_v56  ;;  %v1160_v18 = vsel %vm1112_vm5, %v1061_v15, 0.0 }
 0x26f   : > { %v2817_v41 = vpop.eup %2816  ;;  %v1100_v3 = vadd.s32 %v3544_v17, %v1083_v22  ;;  %v1180_v48 = vsel %vm1174_vm3, %v1160_v18, 0.0  ;;  %v1002_v22 = vmul.f32 0.5, %v3551_v35  ;;  %vm1213_vm5 = vcmask 122880  }
 0x270   : > { %v2819_v50 = vpop.eup %2818  ;;  %v1159_v36 = vsel %vm1111_vm6, %v1060_v31, 0.0  ;;  %v1046_v32 = vadd.f32 1.0, %v2817_v41  ;;  %v1063_v26 = vmul.f32 %v1047_v37, %v999_v34  ;;  %v1000_v34 = vmul.f32 0.5, %v3601_v6 }
 0x271   : > { %v2821_v58 = vpop.eup %2820  ;;  %v1178_v39 = vsel %vm1174_vm3, %v1159_v36, 0.0  ;;  %v1050_v15 = vadd.f32 1.0, %v2819_v50  ;;  %vm1116_vm10 = vcmp.lt.s32.totalorder %v1100_v3, 300  ;;  %v1005_v6 = vmul.f32 0.5, %v3588_v27 }
 0x272   : > { %v1179_v33 = vadd.f32 %v1178_v39, %v1177_v4  ;;  %v1062_v0 = vmul.f32 %v1046_v32, %v998_v49  ;;  %v2823_v24 = vpop.eup %2822  ;;  %v1049_v7 = vadd.f32 1.0, %v2821_v58  ;;  %v1162_v16 = vsel %vm1114_vm7, %v1063_v26, 0.0 }
 0x273   : > { %v2825_v13 = vpop.eup %2824  ;;  %v1051_v41 = vadd.f32 1.0, %v2823_v24  ;;  %v1184_v1 = vsel %vm1174_vm3, %v1162_v16, 0.0  ;;  %v1088_v49 = vadd.s32 96, %v3532_v8  ;;  %v1066_v4 = vmul.f32 %v1050_v15, %v1002_v22 }
 0x274   : > { %v1161_v9 = vsel %vm1113_vm8, %v1062_v0, 0.0  ;;  %v1181_v19 = vadd.f32 %v1180_v48, %v1179_v33  ;;  %v2827_v56 = vpop.eup %2826  ;;  %v1065_v53 = vmul.f32 %v1049_v7, %v1001_v20  ;;  %v1048_v37 = vadd.f32 1.0, %v2825_v13 }
 0x275   : > { %v1182_v31 = vsel %vm1174_vm3, %v1161_v9, 0.0  ;;  %v2829_v42 = vpop.eup %2828  ;;  %v1052_v12 = vadd.f32 1.0, %v2827_v56  ;;  %v1004_v36 = vmul.f32 0.5, %v3580_v54  ;;  %v1067_v32 = vmul.f32 %v1051_v41, %v1003_v62 }
 0x276   : > { %v1183_v30 = vadd.f32 %v1182_v31, %v1181_v19  ;;  %v2831_v50 = vpop.eup %2830  ;;  %v1064_v18 = vmul.f32 %v1048_v37, %v1000_v34  ;;  %v1053_v58 = vadd.f32 1.0, %v2829_v42  ;;  %v1164_v39 = vsel %vm1116_vm10, %v1065_v53, 0.0 }
 0x277   : > { %v2833_v33 = vpop.eup %2832  ;;  %v1089_v0 = vadd.s32 104, %v3532_v8  ;;  %v1105_v3 = vadd.s32 %v3544_v17, %v1088_v49  ;;  %v1165_v48 = vsel %vm1117_vm12, %v1066_v4, 0.0  ;;  %v1068_v27 = vmul.f32 %v1052_v12, %v1004_v36 }
 0x278   : > { %v1185_v35 = vadd.f32 %v1184_v1, %v1183_v30  ;;  %v1163_v26 = vsel %vm1115_vm11, %v1064_v18, 0.0  ;;  %v2835_v63 = vpop.eup %2834  ;;  %v1054_v20 = vadd.f32 1.0, %v2831_v50  ;;  %v1007_v54 = vmul.f32 0.5, %v3614_v40 }
 0x279   : > { %v1186_v24 = vsel %vm1174_vm3, %v1163_v26, 0.0  ;;  %v1188_v13 = vsel %vm1174_vm3, %v1164_v39, 0.0  ;;  %v1090_v15 = vadd.s32 112, %v3532_v8  ;;  %v1166_v16 = vsel %vm1118_vm9, %v1067_v32, 0.0  ;;  %v2837_v62 = vpop.eup %2836 }
 0x27a   : > { %v1187_v7 = vadd.f32 %v1186_v24, %v1185_v35  ;;  %v1069_v9 = vmul.f32 %v1053_v58, %v1005_v6  ;;  %v1055_v19 = vadd.f32 1.0, %v2833_v33  ;;  %v1190_v22 = vsel %vm1174_vm3, %v1165_v48, 0.0 }
 0x27b   : > { %v1106_v31 = vadd.s32 %v3544_v17, %v1089_v0  ;;  %vm1121_vm15 = vcmp.lt.s32.totalorder %v1105_v3, 300  ;;  %v1091_v40 = vadd.s32 120, %v3532_v8  ;;  %v1167_v5 = vsel %vm1119_vm14, %v1068_v27, 0.0 }
 0x27c   : > { %v1189_v56 = vadd.f32 %v1188_v13, %v1187_v7  ;;  %v1070_v34 = vmul.f32 %v1054_v20, %v1006_v14  ;;  %v1056_v41 = vadd.f32 1.0, %v2835_v63  ;;  %v1192_v51 = vsel %vm1174_vm3, %v1166_v16, 0.0 }
 0x27d   : > { %v1009_v30 = vmul.f32 0.5, %v3628_v61  ;;  %v1008_v53 = vmul.f32 0.5, %v3621_v47  ;;  %v1107_v37 = vadd.s32 %v3544_v17, %v1090_v15  ;;  %v1168_v1 = vsel %vm1120_vm13, %v1069_v9, 0.0 }
 0x27e   : > { %v1191_v42 = vadd.f32 %v1190_v22, %v1189_v56  ;;  %v1071_v49 = vmul.f32 %v1055_v19, %v1007_v54  ;;  %v1057_v50 = vadd.f32 1.0, %v2837_v62  ;;  %v1194_v11 = vsel %vm1174_vm3, %v1167_v5, 0.0  ;;  %v1173_v54 = vld [vmem:[#allocation2] sm:$0x1] }
 0x27f   : > { %vm1122_vm1 = vcmp.lt.s32.totalorder %v1106_v31, 300  ;;  %v1108_v4 = vadd.s32 %v3544_v17, %v1091_v40  ;;  %v1169_v12 = vsel %vm1121_vm15, %v1070_v34, 0.0  ;;  %v1072_v18 = vmul.f32 %v1056_v41, %v1008_v53 }
 0x280   : > { %v1193_v8 = vadd.f32 %v1192_v51, %v1191_v42  ;;  %v1196_v61 = vsel %vm1174_vm3, %v1168_v1, 0.0  ;;  %vm1123_vm2 = vcmp.lt.s32.totalorder %v1107_v37, 300  ;;  %v1170_v47 = vsel %vm1122_vm1, %v1071_v49, 0.0 }
 0x281   : > { %v1073_v6 = vmul.f32 %v1057_v50, %v1009_v30  ;;  %v1198_v10 = vsel %vm1174_vm3, %v1169_v12, 0.0  ;;  %vm1124_vm4 = vcmp.lt.s32.totalorder %v1108_v4, 300  ;;  %v1171_v32 = vsel %vm1123_vm2, %v1072_v18, 0.0 }
 0x282   : > { %v1195_v35 = vadd.f32 %v1194_v11, %v1193_v8  ;;  %v1200_v39 = vsel %vm1174_vm3, %v1170_v47, 0.0  ;;  %v1202_v17 = vsel %vm1174_vm3, %v1171_v32, 0.0 }
 0x283   : > { %v1172_v26 = vsel %vm1124_vm4, %v1073_v6, 0.0 }
 0x284   : > { %v1197_v36 = vadd.f32 %v1196_v61, %v1195_v35  ;;  %v1204_v3 = vsel %vm1174_vm3, %v1172_v26, 0.0 }
 0x286   : > { %v1199_v58 = vadd.f32 %v1198_v10, %v1197_v36 }
 0x288   : > { %v1201_v33 = vadd.f32 %v1200_v39, %v1199_v58 }
 0x28a   : > { %v1203_v0 = vadd.f32 %v1202_v17, %v1201_v33 }
 0x28c   : > { %v1205_v24 = vadd.f32 %v1204_v3, %v1203_v0 }
 0x28e   : > { %v1206_v63 = vrot.slane %v1205_v24, 4 }
 0x290   : > { %v1207_v48 = vadd.f32 %v1206_v63, %v1205_v24 }
 0x292   : > { %v1208_v27 = vrot.slane %v1207_v48, 2 }
 0x294   : > { %v1209_v20 = vadd.f32 %v1208_v27, %v1207_v48 }
 0x296   : > { %v1210_v7 = vrot.slane %v1209_v20, 1 }
 0x298   : > { %v1211_v14 = vadd.f32 %v1210_v7, %v1209_v20 }
 0x29a   : > { %v1212_v13 = vadd.f32 %v1211_v14, %v1173_v54 }
 0x29c   : > { %1214 = vst.msk [vmem:[#allocation2] sm:$0x1] %vm1213_vm5, %v1212_v13 }
 0x29d PF: > { %p1215_p6 = scmp.eq.s32.totalorder %s3018_s18, 2 }
 0x29f   : > { %p1216_p8 = pnand %p1215_p6, %p507_p1 }
 0x2a1   : > { %1219 = sbr.rel (%p1216_p8) target bundleno = 879 (0x36f), region = 88 }
 0x2a6   : > { %v1223_v15 = vld [vmem:[%s4038_s8 + $0x8] sm:$0xff]  ;;  %v1220_v16 = vld [vmem:[#allocation2] sm:$0x1]  ;;  %v3045_v9 = vmov 0.0   ;;  %vm3046_vm3 = vmmov 0   ;;  %vm1225_vm6 = vcmask 130048  }
 0x2a7   : > { %2575 = vmatprep.subr.mxu0 %v3045_v9  ;;  %v1222_v19 = vld [vmem:[%s4038_s8] sm:$0xff]  ;;  %2579 = vmatprep.mubr.msk.f32.mxu0 %vm3046_vm3, %v3045_v9  ;;  %v1221_v56 = vmul.f32 0.0033333334, %v1220_v16  ;;  %vm1299_vm7 = vcmask 122880  }
 0x2a8   : > { %2576 = vmatpush3.msra.mxu0 %v1223_v15  ;;  %v1224_v62 = vld [vmem:[%s4039_s9] sm:$0x1] }
 0x2a9   : > { %2577 = vmatprep.subr.mxu0 %v3045_v9 }
 0x2aa   : > { %2578 = vmatpush3.msra.mxu0 %v1222_v19 }
 0x2ab   : > { %2580 = vmatmul.mubr.msk.f32.vlgmr.msra.gmra.mxu0 %vm1225_vm6, %v1221_v56 }
 0x36b   : > { %v1295_v22 = vpop.f32.mrf.mxu0 }
 0x36c   : > { %v1296_v31 = vadd.f32 %v1295_v22, %v1224_v62 }
 0x36d   : > { %v2581_v40 = vpop.f32.mrf.mxu0 }
 0x36e   : > { %1300 = vst.msk [vmem:[#allocation3] sm:$0x1] %vm1299_vm7, %v1296_v31 }
 0x36f PF: > { %p2407_p9 = scmp.ne.s32.totalorder %s3022_s19, 1 }
 0x370   : > { %s4079_s3 = sld [smem:[#allocation20_spill]] (!%p2407_p9) }
 0x371   : > { %1304 = sbr.rel (%p2407_p9) target bundleno = 1819 (0x71b), region = 92  ;;  %s4080_s4 = sld [smem:[#allocation21_spill]] (!%p2407_p9) }
 0x376   : > { %v1308_v5 = vld [vmem:[%s4079_s3 + $0x18] sm:$0xff]  ;;  %v1307_v34 = vld [vmem:[%s4079_s3 + $0x10] sm:$0xff]  ;;  %2590 = vmatprep.mubr.msk.f32.mxu0 %vm526_vm0, %v3395_v43  ;;  %v1590_v42 = vld [vmem:[%s4037_s7 + $0x8] sm:$0xff]  ;;  %vm2177_vm8 = vcmask 64512  }
 0x377   : > { %2582 = vmatprep.subr.mxu0 %v1308_v5  ;;  %v1306_v41 = vld [vmem:[%s4079_s3 + $0x8] sm:$0xff]  ;;  %2678 = vmatprep.subr.mxu1 %v1590_v42  ;;  %v1305_v51 = vld [vmem:[%s4079_s3] sm:$0xff] }
 0x378   : > { %2583 = vmatpush3.msra.mxu0 %v1308_v5  ;;  %2680 = vmatpush3.msra.mxu1 %v1590_v42  ;;  %v1589_v43 = vld [vmem:[%s4037_s7] sm:$0xff] }
 0x379   : > { %2584 = vmatprep.subr.mxu0 %v1307_v34  ;;  %2679 = vmatprep.subr.mxu1 %v1589_v43 }
 0x37a   : > { %2585 = vmatpush3.msra.mxu0 %v1307_v34  ;;  %2681 = vmatpush3.msra.mxu1 %v1589_v43 }
 0x37b   : > { %2586 = vmatprep.subr.mxu0 %v1306_v41 }
 0x37c   : > { %2587 = vmatpush3.msra.mxu0 %v1306_v41 }
 0x37d   : > { %2588 = vmatprep.subr.mxu0 %v1305_v51 }
 0x37e   : > { %2589 = vmatpush3.msra.mxu0 %v1305_v51 }
 0x37f   : > { %2591 = vmatmul.mubr.msk.f32.vlgmr.msra.gmra.mxu0 %vm526_vm0, %v3402_v57  ;;  %2614 = vmatprep.subr.mxu0 %v1590_v42  ;;  %v3758_v57 = vld [vmem:[%s4080_s4] ss:$0 sm:$0xff] }
 0x380   : > { %2593 = vmatprep.mubr.msk.f32.mxu0 %vm526_vm0, %v3406_v38  ;;  %2615 = vmatpush3.msra.mxu0 %v1590_v42 }
 0x381   : > { %2616 = vmatprep.subr.mxu0 %v1589_v43 }
 0x382   : > { %2617 = vmatpush3.msra.mxu0 %v1589_v43 }
 0x383   : > { %2594 = vmatmul.mubr.msk.f32.gmra.mxu0 %vm526_vm0, %v3412_v46 }
 0x384   : > { %2596 = vmatprep.mubr.msk.f32.mxu0 %vm526_vm0, %v3416_v55 }
 0x387   : > { %2597 = vmatmul.mubr.msk.f32.gmra.mxu0 %vm526_vm0, %v3422_v23 }
 0x388   : > { %2599 = vmatprep.mubr.msk.f32.mxu0 %vm526_vm0, %v3426_v28 }
 0x38b   : > { %2600 = vmatmul.mubr.msk.f32.gmra.mxu0 %vm526_vm0, %v3432_v21 }
 0x38c   : > { %2602 = vmatprep.mubr.msk.f32.mxu0 %vm526_vm0, %v3436_v2 }
 0x38f   : > { %2603 = vmatmul.mubr.msk.f32.gmra.mxu0 %vm526_vm0, %v3442_v44 }
 0x390   : > { %2605 = vmatprep.mubr.msk.f32.mxu0 %vm526_vm0, %v3446_v25 }
 0x393   : > { %2606 = vmatmul.mubr.msk.f32.gmra.mxu0 %vm526_vm0, %v3452_v52 }
 0x394   : > { %2608 = vmatprep.mubr.msk.f32.mxu0 %vm526_vm0, %v3456_v29 }
 0x397   : > { %2609 = vmatmul.mubr.msk.f32.gmra.mxu0 %vm526_vm0, %v3462_v45 }
 0x398   : > { %2611 = vmatprep.mubr.msk.f32.mxu0 %vm526_vm0, %v3466_v59 }
 0x39b   : > { %2612 = vmatmul.mubr.msk.f32.gmra.mxu0 %vm526_vm0, %v3470_v60  ;;  %vm1598_vm0 = vcmask 130048  }
 0x43f   : > { %v2592_v38 = vpop.f32.mrf.mxu0 }
 0x440   : > { %v1436_v46 = vadd.f32 %v2592_v38, %v3758_v57 }
 0x441   : > { %v1430_v55 = vpop.f32.mrf.mxu0 }
 0x442   : > { %v1526_v23 = vmul.f32 0.70710677, %v1436_v46  ;;  %v1431_v28 = vadd.f32 %v3758_v57, %v1430_v55  ;;  %v1510_v0 = vmul.f32 0.5, %v1436_v46 }
 0x443   : > { %v2595_v21 = vpop.f32.mrf.mxu0 }
 0x444   : > { %2838 = verf.f32 %v1526_v23  ;;  %v1525_v2 = vmul.f32 0.70710677, %v1431_v28  ;;  %v1446_v44 = vadd.f32 %v2595_v21, %v3758_v57  ;;  %v1509_v39 = vmul.f32 0.5, %v1431_v28 }
 0x445   : > { %v1440_v25 = vpop.f32.mrf.mxu0 }
 0x446   : > { %2840 = verf.f32 %v1525_v2  ;;  %v1528_v52 = vmul.f32 0.70710677, %v1446_v44  ;;  %v1441_v29 = vadd.f32 %v3758_v57, %v1440_v25  ;;  %v1512_v19 = vmul.f32 0.5, %v1446_v44 }
 0x447   : > { %v2598_v45 = vpop.f32.mrf.mxu0 }
 0x448   : > { %2842 = verf.f32 %v1528_v52  ;;  %v1527_v59 = vmul.f32 0.70710677, %v1441_v29  ;;  %v3765_v60 = vadd.f32 %v2598_v45, %v3758_v57  ;;  %v1511_v13 = vmul.f32 0.5, %v1441_v29 }
 0x449   : > { %v1450_v30 = vpop.f32.mrf.mxu0 }
 0x44a   : > { %2844 = verf.f32 %v1527_v59  ;;  %v1530_v53 = vmul.f32 0.70710677, %v3765_v60  ;;  %v1451_v37 = vadd.f32 %v3758_v57, %v1450_v30  ;;  %v1514_v55 = vmul.f32 0.5, %v3765_v60 }
 0x44b   : > { %v2601_v1 = vpop.f32.mrf.mxu0 }
 0x44c   : > { %2846 = verf.f32 %v1530_v53  ;;  %v1529_v49 = vmul.f32 0.70710677, %v1451_v37  ;;  %v3770_v50 = vadd.f32 %v2601_v1, %v3758_v57  ;;  %v1513_v51 = vmul.f32 0.5, %v1451_v37 }
 0x44d   : > { %v1460_v8 = vpop.f32.mrf.mxu0 }
 0x44e   : > { %2848 = verf.f32 %v1529_v49  ;;  %v1532_v11 = vmul.f32 0.70710677, %v3770_v50  ;;  %v3774_v4 = vadd.f32 %v3758_v57, %v1460_v8  ;;  %v1516_v60 = vmul.f32 0.5, %v3770_v50 }
 0x44f   : > { %v2604_v12 = vpop.f32.mrf.mxu0 }
 0x450   : > { %2850 = verf.f32 %v1532_v11  ;;  %v1531_v18 = vmul.f32 0.70710677, %v3774_v4  ;;  %v3778_v35 = vadd.f32 %v2604_v12, %v3758_v57  ;;  %v1515_v45 = vmul.f32 0.5, %v3774_v4 }
 0x451   : > { %v2839_v61 = vpop.eup %2838  ;;  %v1470_v47 = vpop.f32.mrf.mxu0 }
 0x452   : > { %2852 = verf.f32 %v1531_v18  ;;  %v1534_v6 = vmul.f32 0.70710677, %v3778_v35  ;;  %v1558_v10 = vadd.f32 1.0, %v2839_v61  ;;  %v3782_v32 = vadd.f32 %v3758_v57, %v1470_v47 }
 0x453   : > { %v2841_v36 = vpop.eup %2840  ;;  %v2607_v58 = vpop.f32.mrf.mxu0  ;;  %v1518_v37 = vmul.f32 0.5, %v3778_v35 }
 0x454   : > { %v1557_v26 = vadd.f32 1.0, %v2841_v36  ;;  %2854 = verf.f32 %v1534_v6  ;;  %v3785_v33 = vadd.f32 %v2607_v58, %v3758_v57  ;;  %v1533_v3 = vmul.f32 0.70710677, %v3782_v32 }
 0x455   : > { %v2843_v17 = vpop.eup %2842  ;;  %v1480_v24 = vpop.f32.mrf.mxu0  ;;  %v1574_v20 = vmul.f32 %v1558_v10, %v1510_v0  ;;  %v1517_v11 = vmul.f32 0.5, %v3782_v32 }
 0x456   : > { %v1573_v63 = vmul.f32 %v1557_v26, %v1509_v39  ;;  %v1536_v48 = vmul.f32 0.70710677, %v3785_v33  ;;  %v1560_v7 = vadd.f32 1.0, %v2843_v17  ;;  %2856 = verf.f32 %v1533_v3 }
 0x457   : > { %v2845_v27 = vpop.eup %2844  ;;  %v1481_v54 = vadd.f32 %v3758_v57, %v1480_v24  ;;  %v2610_v14 = vpop.f32.mrf.mxu0  ;;  %v1520_v50 = vmul.f32 0.5, %v3785_v33 }
 0x458   : > { %v1559_v15 = vadd.f32 1.0, %v2845_v27  ;;  %2858 = verf.f32 %v1536_v48  ;;  %v1496_v16 = vadd.f32 %v2610_v14, %v3758_v57  ;;  %2618 = vmatprep.mubr.msk.f32.mxu0 %vm1598_vm0, %v1573_v63  ;;  %v1576_v5 = vmul.f32 %v1560_v7, %v1512_v19 }
 0x459   : > { %v2847_v9 = vpop.eup %2846  ;;  %v1535_v56 = vmul.f32 0.70710677, %v1481_v54  ;;  %v1490_v62 = vpop.f32.mrf.mxu0  ;;  %2619 = vmatmul.mubr.msk.f32.vlgmr.msra.gmra.mxu0 %vm1598_vm0, %v1574_v20  ;;  %v1519_v6 = vmul.f32 0.5, %v1481_v54 }
 0x45a   : > { %v1575_v22 = vmul.f32 %v1559_v15, %v1511_v13  ;;  %v1538_v31 = vmul.f32 0.70710677, %v1496_v16  ;;  %v1562_v34 = vadd.f32 1.0, %v2847_v9  ;;  %v1491_v42 = vadd.f32 %v3758_v57, %v1490_v62  ;;  %v1873_v15 = vld [vmem:[%s4040_s10 + $0x8] sm:$0xff]  ;;  %v3822_v9 = vld [vmem:[#allocation3] ss:$0 sm:$0xff] }
 0x45b   : > { %v2849_v40 = vpop.eup %2848  ;;  %2860 = verf.f32 %v1535_v56  ;;  %v2613_v41 = vpop.f32.mrf.mxu0  ;;  %v1522_v58 = vmul.f32 0.5, %v1496_v16  ;;  %2642 = vmatprep.subr.mxu1 %v1873_v15  ;;  %v1872_v16 = vld [vmem:[%s4040_s10] sm:$0xff] }
 0x45c   : > { %v1561_v43 = vadd.f32 1.0, %v2849_v40  ;;  %2862 = verf.f32 %v1538_v31  ;;  %v1506_v38 = vadd.f32 %v2613_v41, %v3758_v57  ;;  %2621 = vmatprep.mubr.msk.f32.mxu0 %vm1598_vm0, %v1575_v22  ;;  %v1537_v23 = vmul.f32 0.70710677, %v1491_v42 }
 0x45d   : > { %v2851_v46 = vpop.eup %2850  ;;  %v1500_v28 = vpop.f32.mrf.mxu0  ;;  %2622 = vmatmul.mubr.msk.f32.gmra.mxu0 %vm1598_vm0, %v1576_v5  ;;  %v1578_v25 = vmul.f32 %v1562_v34, %v1514_v55  ;;  %v1521_v17 = vmul.f32 0.5, %v1491_v42 }
 0x45e   : > { %v1577_v21 = vmul.f32 %v1561_v43, %v1513_v51  ;;  %v1540_v2 = vmul.f32 0.70710677, %v1506_v38  ;;  %v1564_v52 = vadd.f32 1.0, %v2851_v46  ;;  %2864 = verf.f32 %v1537_v23 }
 0x45f   : > { %v2853_v44 = vpop.eup %2852  ;;  %v1501_v29 = vadd.f32 %v3758_v57, %v1500_v28  ;;  %v1524_v63 = vmul.f32 0.5, %v1506_v38 }
 0x460   : > { %2866 = verf.f32 %v1540_v2  ;;  %2624 = vmatprep.mubr.msk.f32.mxu0 %vm1598_vm0, %v1577_v21  ;;  %v1563_v59 = vadd.f32 1.0, %v2853_v44  ;;  %v1580_v8 = vmul.f32 %v1564_v52, %v1516_v60 }
 0x461   : > { %v2855_v30 = vpop.eup %2854  ;;  %v1539_v53 = vmul.f32 0.70710677, %v1501_v29  ;;  %2625 = vmatmul.mubr.msk.f32.gmra.mxu0 %vm1598_vm0, %v1578_v25  ;;  %v1523_v20 = vmul.f32 0.5, %v1501_v29 }
 0x462   : > { %v1566_v1 = vadd.f32 1.0, %v2855_v30  ;;  %v1579_v49 = vmul.f32 %v1563_v59, %v1515_v45 }
 0x463   : > { %2868 = verf.f32 %v1539_v53  ;;  %v2857_v57 = vpop.eup %2856 }
 0x464   : > { %2627 = vmatprep.mubr.msk.f32.mxu1 %vm1598_vm0, %v1579_v49  ;;  %v1565_v12 = vadd.f32 1.0, %v2857_v57  ;;  %v1582_v18 = vmul.f32 %v1566_v1, %v1518_v37 }
 0x465   : > { %v2859_v4 = vpop.eup %2858  ;;  %2628 = vmatmul.mubr.msk.f32.vlgmr.msra.gmra.mxu1 %vm1598_vm0, %v1580_v8 }
 0x466   : > { %v1568_v61 = vadd.f32 1.0, %v2859_v4  ;;  %v1581_v47 = vmul.f32 %v1565_v12, %v1517_v11  ;;  %2643 = vmatpush3.msra.mxu1 %v1873_v15 }
 0x467   : > { %2644 = vmatprep.subr.mxu1 %v1872_v16 }
 0x468   : > { %v2861_v35 = vpop.eup %2860  ;;  %2630 = vmatprep.mubr.msk.f32.mxu1 %vm1598_vm0, %v1581_v47  ;;  %v1584_v32 = vmul.f32 %v1568_v61, %v1520_v50  ;;  %2645 = vmatpush3.msra.mxu1 %v1872_v16 }
 0x469   : > { %v2863_v36 = vpop.eup %2862  ;;  %v1567_v10 = vadd.f32 1.0, %v2861_v35  ;;  %2631 = vmatmul.mubr.msk.f32.gmra.mxu1 %vm1598_vm0, %v1582_v18 }
 0x46a   : > { %v1570_v39 = vadd.f32 1.0, %v2863_v36 }
 0x46b   : > { %v1583_v26 = vmul.f32 %v1567_v10, %v1519_v6  ;;  %v2865_v0 = vpop.eup %2864 }
 0x46c   : > { %v1569_v24 = vadd.f32 1.0, %v2865_v0  ;;  %v1586_v33 = vmul.f32 %v1570_v39, %v1522_v58 }
 0x46d   : > { %v2867_v3 = vpop.eup %2866  ;;  %2633 = vmatprep.mubr.msk.f32.mxu1 %vm1598_vm0, %v1583_v26 }
 0x46e   : > { %v1572_v48 = vadd.f32 1.0, %v2867_v3  ;;  %2634 = vmatmul.mubr.msk.f32.gmra.mxu1 %vm1598_vm0, %v1584_v32  ;;  %v1585_v27 = vmul.f32 %v1569_v24, %v1521_v17 }
 0x470   : > { %v2869_v7 = vpop.eup %2868  ;;  %2636 = vmatprep.mubr.msk.f32.mxu1 %vm1598_vm0, %v1585_v27  ;;  %v1588_v14 = vmul.f32 %v1572_v48, %v1524_v63 }
 0x471   : > { %v1571_v54 = vadd.f32 1.0, %v2869_v7 }
 0x472   : > { %2637 = vmatmul.mubr.msk.f32.gmra.mxu1 %vm1598_vm0, %v1586_v33 }
 0x473   : > { %v1587_v13 = vmul.f32 %v1571_v54, %v1523_v20 }
 0x475   : > { %2639 = vmatprep.mubr.msk.f32.mxu1 %vm1598_vm0, %v1587_v13 }
 0x476   : > { %2640 = vmatmul.mubr.msk.f32.gmra.mxu1 %vm1598_vm0, %v1588_v14 }
 0x519   : > { %v2620_v19 = vpop.f32.mrf.mxu0 }
 0x51a   : > { %v1719_v56 = vadd.f32 %v2620_v19, %v3822_v9 }
 0x51b   : > { %v1713_v62 = vpop.f32.mrf.mxu0 }
 0x51c   : > { %v1809_v22 = vmul.f32 0.70710677, %v1719_v56  ;;  %v1714_v31 = vadd.f32 %v3822_v9, %v1713_v62  ;;  %v1793_v11 = vmul.f32 0.5, %v1719_v56 }
 0x51d   : > { %v2623_v40 = vpop.f32.mrf.mxu0 }
 0x51e   : > { %2870 = verf.f32 %v1809_v22  ;;  %v1808_v5 = vmul.f32 0.70710677, %v1714_v31  ;;  %v1729_v34 = vadd.f32 %v2623_v40, %v3822_v9  ;;  %v1792_v57 = vmul.f32 0.5, %v1714_v31 }
 0x51f   : > { %v1723_v42 = vpop.f32.mrf.mxu0 }
 0x520   : > { %2872 = verf.f32 %v1808_v5  ;;  %v1811_v41 = vmul.f32 0.70710677, %v1729_v34  ;;  %v1724_v51 = vadd.f32 %v3822_v9, %v1723_v42  ;;  %v1795_v3 = vmul.f32 0.5, %v1729_v34 }
 0x521   : > { %v2626_v43 = vpop.f32.mrf.mxu0 }
 0x522   : > { %2874 = verf.f32 %v1811_v41  ;;  %v1810_v38 = vmul.f32 0.70710677, %v1724_v51  ;;  %v1739_v46 = vadd.f32 %v2626_v43, %v3822_v9  ;;  %v1794_v39 = vmul.f32 0.5, %v1724_v51 }
 0x523   : > { %v1733_v55 = vpop.f32.mrf.mxu0 }
 0x524   : > { %2876 = verf.f32 %v1810_v38  ;;  %v1813_v23 = vmul.f32 0.70710677, %v1739_v46  ;;  %v1734_v28 = vadd.f32 %v3822_v9, %v1733_v55  ;;  %v1797_v13 = vmul.f32 0.5, %v1739_v46 }
 0x525   : > { %v2629_v21 = vpop.f32.mrf.mxu1 }
 0x526   : > { %2878 = verf.f32 %v1813_v23  ;;  %v1812_v2 = vmul.f32 0.70710677, %v1734_v28  ;;  %v3831_v44 = vadd.f32 %v2629_v21, %v3822_v9  ;;  %v1796_v15 = vmul.f32 0.5, %v1734_v28 }
 0x527   : > { %v1743_v25 = vpop.f32.mrf.mxu1 }
 0x528   : > { %2880 = verf.f32 %v1812_v2  ;;  %v1815_v52 = vmul.f32 0.70710677, %v3831_v44  ;;  %v3835_v29 = vadd.f32 %v3822_v9, %v1743_v25  ;;  %v1799_v46 = vmul.f32 0.5, %v3831_v44 }
 0x529   : > { %v2632_v59 = vpop.f32.mrf.mxu1 }
 0x52a   : > { %2882 = verf.f32 %v1815_v52  ;;  %v1814_v45 = vmul.f32 0.70710677, %v3835_v29  ;;  %v3839_v60 = vadd.f32 %v2632_v59, %v3822_v9  ;;  %v1798_v43 = vmul.f32 0.5, %v3835_v29 }
 0x52b   : > { %v2871_v30 = vpop.eup %2870  ;;  %v1753_v37 = vpop.f32.mrf.mxu1 }
 0x52c   : > { %v1841_v53 = vadd.f32 1.0, %v2871_v30  ;;  %2884 = verf.f32 %v1814_v45  ;;  %v1817_v49 = vmul.f32 0.70710677, %v3839_v60  ;;  %v3843_v8 = vadd.f32 %v3822_v9, %v1753_v37 }
 0x52d   : > { %v2873_v1 = vpop.eup %2872  ;;  %v1801_v44 = vmul.f32 0.5, %v3839_v60 }
 0x52e   : > { %v1840_v4 = vadd.f32 1.0, %v2873_v1  ;;  %v2635_v12 = vpop.f32.mrf.mxu1  ;;  %2886 = verf.f32 %v1817_v49  ;;  %v1816_v50 = vmul.f32 0.70710677, %v3843_v8  ;;  %v1857_v47 = vmul.f32 %v1841_v53, %v1793_v11 }
 0x52f   : > { %v2875_v18 = vpop.eup %2874  ;;  %v3847_v61 = vadd.f32 %v2635_v12, %v3822_v9 }
 0x530   : > { %v1856_v6 = vmul.f32 %v1840_v4, %v1792_v57  ;;  %v1763_v35 = vpop.f32.mrf.mxu1  ;;  %v1843_v10 = vadd.f32 1.0, %v2875_v18  ;;  %2888 = verf.f32 %v1816_v50 }
 0x531   : > { %v2877_v36 = vpop.eup %2876  ;;  %v1819_v32 = vmul.f32 0.70710677, %v3847_v61  ;;  %v1764_v58 = vadd.f32 %v3822_v9, %v1763_v35  ;;  %v1803_v11 = vmul.f32 0.5, %v3847_v61 }
 0x532   : > { %v1842_v26 = vadd.f32 1.0, %v2877_v36  ;;  %v2638_v17 = vpop.f32.mrf.mxu1  ;;  %2646 = vmatprep.mubr.msk.f32.mxu1 %vm1598_vm0, %v1856_v6  ;;  %v1859_v7 = vmul.f32 %v1843_v10, %v1795_v3 }
 0x533   : > { %v2879_v0 = vpop.eup %2878  ;;  %2890 = verf.f32 %v1819_v32  ;;  %v1818_v24 = vmul.f32 0.70710677, %v1764_v58  ;;  %v3853_v33 = vadd.f32 %v2638_v17, %v3822_v9  ;;  %2647 = vmatmul.mubr.msk.f32.vlgmr.msra.gmra.mxu1 %vm1598_vm0, %v1857_v47  ;;  %v1802_v37 = vmul.f32 0.5, %v1764_v58  ;;  %v3883_v17 = vld [vmem:[%s4041_s11] ss:$0 sm:$0xff] }
 0x534   : > { %v1858_v63 = vmul.f32 %v1842_v26, %v1794_v39  ;;  %v1845_v48 = vadd.f32 1.0, %v2879_v0  ;;  %v1773_v27 = vpop.f32.mrf.mxu1 }
 0x535   : > { %v2881_v20 = vpop.eup %2880  ;;  %2892 = verf.f32 %v1818_v24  ;;  %v1821_v54 = vmul.f32 0.70710677, %v3853_v33  ;;  %v1774_v14 = vadd.f32 %v3822_v9, %v1773_v27  ;;  %v1805_v47 = vmul.f32 0.5, %v3853_v33 }
 0x536   : > { %v1844_v16 = vadd.f32 1.0, %v2881_v20  ;;  %v2641_v19 = vpop.f32.mrf.mxu1  ;;  %2649 = vmatprep.mubr.msk.f32.mxu1 %vm1598_vm0, %v1858_v63  ;;  %v1861_v31 = vmul.f32 %v1845_v48, %v1797_v13 }
 0x537   : > { %v2883_v56 = vpop.eup %2882  ;;  %2894 = verf.f32 %v1821_v54  ;;  %v1820_v62 = vmul.f32 0.70710677, %v1774_v14  ;;  %v1789_v22 = vadd.f32 %v2641_v19, %v3822_v9  ;;  %2650 = vmatmul.mubr.msk.f32.gmra.mxu1 %vm1598_vm0, %v1859_v7  ;;  %v1804_v18 = vmul.f32 0.5, %v1774_v14 }
 0x538   : > { %v1860_v40 = vmul.f32 %v1844_v16, %v1796_v15  ;;  %v1783_v5 = vpop.f32.mrf.mxu1  ;;  %v1847_v42 = vadd.f32 1.0, %v2883_v56 }
 0x539   : > { %v2885_v34 = vpop.eup %2884  ;;  %2896 = verf.f32 %v1820_v62  ;;  %v1823_v41 = vmul.f32 0.70710677, %v1789_v22  ;;  %v1784_v51 = vadd.f32 %v3822_v9, %v1783_v5  ;;  %v1800_v9 = vmul.f32 0.5, %v3843_v8 }
 0x53a   : > { %v1846_v38 = vadd.f32 1.0, %v2885_v34  ;;  %2652 = vmatprep.mubr.msk.f32.mxu1 %vm1598_vm0, %v1860_v40  ;;  %v1863_v21 = vmul.f32 %v1847_v42, %v1799_v46  ;;  %v1807_v58 = vmul.f32 0.5, %v1789_v22 }
 0x53b   : > { %2898 = verf.f32 %v1823_v41  ;;  %v1822_v55 = vmul.f32 0.70710677, %v1784_v51  ;;  %2653 = vmatmul.mubr.msk.f32.gmra.mxu1 %vm1598_vm0, %v1861_v31  ;;  %v2887_v23 = vpop.eup %2886  ;;  %v1806_v61 = vmul.f32 0.5, %v1784_v51 }
 0x53c   : > { %v1862_v28 = vmul.f32 %v1846_v38, %v1798_v43  ;;  %v1849_v25 = vadd.f32 1.0, %v2887_v23 }
 0x53d   : > { %2900 = verf.f32 %v1822_v55  ;;  %v2889_v2 = vpop.eup %2888 }
 0x53e   : > { %2655 = vmatprep.mubr.msk.f32.mxu1 %vm1598_vm0, %v1862_v28  ;;  %v1848_v52 = vadd.f32 1.0, %v2889_v2  ;;  %v1865_v30 = vmul.f32 %v1849_v25, %v1801_v44  ;;  %v3909_v25 = vld [vmem:[%s4042_s12] ss:$0 sm:$0xff] }
 0x53f   : > { %2656 = vmatmul.mubr.msk.f32.gmra.mxu1 %vm1598_vm0, %v1863_v21 }
 0x540   : > { %v2891_v29 = vpop.eup %2890  ;;  %v1864_v45 = vmul.f32 %v1848_v52, %v1800_v9 }
 0x541   : > { %v1851_v53 = vadd.f32 1.0, %v2891_v29 }
 0x542   : > { %v2893_v59 = vpop.eup %2892  ;;  %2658 = vmatprep.mubr.msk.f32.mxu1 %vm1598_vm0, %v1864_v45 }
 0x543   : > { %v1850_v1 = vadd.f32 1.0, %v2893_v59  ;;  %2659 = vmatmul.mubr.msk.f32.gmra.mxu1 %vm1598_vm0, %v1865_v30  ;;  %v1867_v4 = vmul.f32 %v1851_v53, %v1803_v11 }
 0x544   : > { %v2895_v49 = vpop.eup %2894 }
 0x545   : > { %v1866_v8 = vmul.f32 %v1850_v1, %v1802_v37  ;;  %v1853_v12 = vadd.f32 1.0, %v2895_v49 }
 0x546   : > { %v2897_v57 = vpop.eup %2896 }
 0x547   : > { %v1852_v50 = vadd.f32 1.0, %v2897_v57  ;;  %2661 = vmatprep.mubr.msk.f32.mxu1 %vm1598_vm0, %v1866_v8  ;;  %v1869_v36 = vmul.f32 %v1853_v12, %v1805_v47 }
 0x548   : > { %v2899_v60 = vpop.eup %2898  ;;  %2662 = vmatmul.mubr.msk.f32.gmra.mxu1 %vm1598_vm0, %v1867_v4 }
 0x549   : > { %v1868_v6 = vmul.f32 %v1852_v50, %v1804_v18  ;;  %v1855_v10 = vadd.f32 1.0, %v2899_v60 }
 0x54a   : > { %v2901_v35 = vpop.eup %2900 }
 0x54b   : > { %v1854_v32 = vadd.f32 1.0, %v2901_v35  ;;  %2664 = vmatprep.mubr.msk.f32.mxu1 %vm1598_vm0, %v1868_v6  ;;  %v1871_v26 = vmul.f32 %v1855_v10, %v1807_v58 }
 0x54c   : > { %2665 = vmatmul.mubr.msk.f32.gmra.mxu1 %vm1598_vm0, %v1869_v36 }
 0x54d   : > { %v1870_v39 = vmul.f32 %v1854_v32, %v1806_v61 }
 0x54f   : > { %2667 = vmatprep.mubr.msk.f32.mxu1 %vm1598_vm0, %v1870_v39 }
 0x550   : > { %2668 = vmatmul.mubr.msk.f32.gmra.mxu1 %vm1598_vm0, %v1871_v26 }
 0x5f3   : > { %v2648_v0 = vpop.f32.mrf.mxu1 }
 0x5f4   : > { %v2001_v3 = vadd.f32 %v2648_v0, %v3883_v17 }
 0x5f5   : > { %v1995_v24 = vpop.f32.mrf.mxu1 }
 0x5f6   : > { %v2091_v33 = vmul.f32 0.70710677, %v2001_v3  ;;  %v1996_v63 = vadd.f32 %v3883_v17, %v1995_v24  ;;  %v2075_v46 = vmul.f32 0.5, %v2001_v3 }
 0x5f7   : > { %v2651_v48 = vpop.f32.mrf.mxu1 }
 0x5f8   : > { %2902 = verf.f32 %v2091_v33  ;;  %v2090_v27 = vmul.f32 0.70710677, %v1996_v63  ;;  %v2011_v20 = vadd.f32 %v2651_v48, %v3883_v17  ;;  %v2074_v9 = vmul.f32 0.5, %v1996_v63 }
 0x5f9   : > { %v2005_v7 = vpop.f32.mrf.mxu1 }
 0x5fa   : > { %2904 = verf.f32 %v2090_v27  ;;  %v2093_v54 = vmul.f32 0.70710677, %v2011_v20  ;;  %v2006_v14 = vadd.f32 %v3883_v17, %v2005_v7  ;;  %v2077_v8 = vmul.f32 0.5, %v2011_v20 }
 0x5fb   : > { %v2654_v13 = vpop.f32.mrf.mxu1 }
 0x5fc   : > { %2906 = verf.f32 %v2093_v54  ;;  %v2092_v15 = vmul.f32 0.70710677, %v2006_v14  ;;  %v2021_v16 = vadd.f32 %v2654_v13, %v3883_v17  ;;  %v2076_v12 = vmul.f32 0.5, %v2006_v14 }
 0x5fd   : > { %v2015_v19 = vpop.f32.mrf.mxu1 }
 0x5fe   : > { %2908 = verf.f32 %v2092_v15  ;;  %v2095_v56 = vmul.f32 0.70710677, %v2021_v16  ;;  %v2016_v62 = vadd.f32 %v3883_v17, %v2015_v19  ;;  %v2079_v26 = vmul.f32 0.5, %v2021_v16 }
 0x5ff   : > { %v2657_v22 = vpop.f32.mrf.mxu1 }
 0x600   : > { %2910 = verf.f32 %v2095_v56  ;;  %v2094_v31 = vmul.f32 0.70710677, %v2016_v62  ;;  %v3892_v40 = vadd.f32 %v2657_v22, %v3883_v17  ;;  %v2078_v24 = vmul.f32 0.5, %v2016_v62 }
 0x601   : > { %v2025_v5 = vpop.f32.mrf.mxu1 }
 0x602   : > { %2912 = verf.f32 %v2094_v31  ;;  %v2097_v34 = vmul.f32 0.70710677, %v3892_v40  ;;  %v3896_v42 = vadd.f32 %v3883_v17, %v2025_v5  ;;  %v2081_v5 = vmul.f32 0.5, %v3892_v40 }
 0x603   : > { %v2660_v51 = vpop.f32.mrf.mxu1 }
 0x604   : > { %2914 = verf.f32 %v2097_v34  ;;  %v2096_v41 = vmul.f32 0.70710677, %v3896_v42  ;;  %v3900_v38 = vadd.f32 %v2660_v51, %v3883_v17  ;;  %v2080_v34 = vmul.f32 0.5, %v3896_v42 }
 0x605   : > { %v2903_v43 = vpop.eup %2902  ;;  %v2035_v55 = vpop.f32.mrf.mxu1 }
 0x606   : > { %2916 = verf.f32 %v2096_v41  ;;  %v2123_v23 = vadd.f32 1.0, %v2903_v43  ;;  %v2099_v21 = vmul.f32 0.70710677, %v3900_v38  ;;  %v3904_v2 = vadd.f32 %v3883_v17, %v2035_v55 }
 0x607   : > { %v2905_v28 = vpop.eup %2904  ;;  %v2083_v42 = vmul.f32 0.5, %v3900_v38 }
 0x608   : > { %v2663_v52 = vpop.f32.mrf.mxu1  ;;  %v2139_v29 = vmul.f32 %v2123_v23, %v2075_v46  ;;  %v2122_v44 = vadd.f32 1.0, %v2905_v28  ;;  %2918 = verf.f32 %v2099_v21  ;;  %v2098_v59 = vmul.f32 0.70710677, %v3904_v2 }
 0x609   : > { %v2907_v45 = vpop.eup %2906  ;;  %v3913_v30 = vadd.f32 %v2663_v52, %v3883_v17 }
 0x60a   : > { %v2045_v53 = vpop.f32.mrf.mxu1  ;;  %v2162_v37 = vmul.f32 %v3909_v25, %v2139_v29  ;;  %v2138_v1 = vmul.f32 %v2122_v44, %v2074_v9  ;;  %v2125_v49 = vadd.f32 1.0, %v2907_v45  ;;  %2920 = verf.f32 %v2098_v59 }
 0x60b   : > { %v2909_v11 = vpop.eup %2908  ;;  %v2101_v57 = vmul.f32 0.70710677, %v3913_v30  ;;  %v3918_v4 = vadd.f32 %v3883_v17, %v2045_v53  ;;  %v2082_v29 = vmul.f32 0.5, %v3904_v2  ;;  %v2085_v38 = vmul.f32 0.5, %v3913_v30 }
 0x60c   : > { %v2666_v18 = vpop.f32.mrf.mxu1  ;;  %v2181_v50 = vsel %vm2177_vm8, %v2162_v37, 0.0  ;;  %v2161_v60 = vmul.f32 %v3909_v25, %v2138_v1  ;;  %v2124_v47 = vadd.f32 1.0, %v2909_v11  ;;  %v2141_v10 = vmul.f32 %v2125_v49, %v2077_v8 }
 0x60d   : > { %v2911_v6 = vpop.eup %2910  ;;  %2922 = verf.f32 %v2101_v57  ;;  %v2100_v35 = vmul.f32 0.70710677, %v3918_v4  ;;  %v3924_v36 = vadd.f32 %v2666_v18, %v3883_v17  ;;  %2182 = vadd.xlane.f32.xlu0 %v2181_v50  ;;  %v2084_v57 = vmul.f32 0.5, %v3918_v4 }
 0x60e   : > { %v2055_v61 = vpop.f32.mrf.mxu1  ;;  %v2140_v32 = vmul.f32 %v2124_v47, %v2076_v12  ;;  %v2127_v58 = vadd.f32 1.0, %v2911_v6  ;;  %v2178_v63 = vsel %vm2177_vm8, %v2161_v60, 0.0  ;;  %v2164_v14 = vmul.f32 %v3909_v25, %v2141_v10 }
 0x60f   : > { %v2913_v39 = vpop.eup %2912  ;;  %2924 = verf.f32 %v2100_v35  ;;  %v2103_v0 = vmul.f32 0.70710677, %v3924_v36  ;;  %v3928_v3 = vadd.f32 %v3883_v17, %v2055_v61 }
 0x610   : > { %v2669_v33 = vpop.f32.mrf.mxu1  ;;  %v2163_v48 = vmul.f32 %v3909_v25, %v2140_v32  ;;  %v2126_v27 = vadd.f32 1.0, %v2913_v39  ;;  %v2143_v19 = vmul.f32 %v2127_v58, %v2079_v26  ;;  %v2187_v46 = vsel %vm2177_vm8, %v2164_v14, 0.0 }
 0x611   : > { %v2915_v20 = vpop.eup %2914  ;;  %2926 = verf.f32 %v2103_v0  ;;  %v2102_v7 = vmul.f32 0.70710677, %v3928_v3  ;;  %v3934_v54 = vadd.f32 %v2669_v33, %v3883_v17  ;;  %2179 = vadd.xlane.f32.xlu0 %v2178_v63  ;;  %v2087_v32 = vmul.f32 0.5, %v3924_v36 }
 0x612   : > { %v2065_v13 = vpop.f32.mrf.mxu1  ;;  %v2184_v15 = vsel %vm2177_vm8, %v2163_v48, 0.0  ;;  %v2142_v16 = vmul.f32 %v2126_v27, %v2078_v24  ;;  %v2129_v56 = vadd.f32 1.0, %v2915_v20  ;;  %v2166_v28 = vmul.f32 %v3909_v25, %v2143_v19 }
 0x613   : > { %v2917_v62 = vpop.eup %2916  ;;  %2928 = verf.f32 %v2102_v7  ;;  %v2105_v22 = vmul.f32 0.70710677, %v3934_v54  ;;  %v2066_v31 = vadd.f32 %v3883_v17, %v2065_v13  ;;  %2185 = vadd.xlane.f32.xlu1 %v2184_v15  ;;  %v2086_v30 = vmul.f32 0.5, %v3928_v3 }
 0x614   : > { %v2165_v41 = vmul.f32 %v3909_v25, %v2142_v16  ;;  %v2128_v51 = vadd.f32 1.0, %v2917_v62  ;;  %v2145_v9 = vmul.f32 %v2129_v56, %v2081_v5  ;;  %v2193_v59 = vsel %vm2177_vm8, %v2166_v28, 0.0 }
 0x615   : > { %2930 = verf.f32 %v2105_v22  ;;  %v2104_v43 = vmul.f32 0.70710677, %v2066_v31  ;;  %v2919_v55 = vpop.eup %2918  ;;  %v2089_v36 = vmul.f32 0.5, %v3934_v54  ;;  %v2088_v20 = vmul.f32 0.5, %v2066_v31 }
 0x616   : > { %v2190_v23 = vsel %vm2177_vm8, %v2165_v41, 0.0  ;;  %v2144_v21 = vmul.f32 %v2128_v51, %v2080_v34  ;;  %v2131_v17 = vadd.f32 1.0, %v2919_v55  ;;  %v2168_v37 = vmul.f32 %v3909_v25, %v2145_v9  ;;  %v2460_v34 = vld [vmem:[#allocation4] ss:$0 sm:$0xff] }
 0x617   : > { %2932 = verf.f32 %v2104_v43  ;;  %2188 = vadd.xlane.f32.xlu1 %v2187_v46  ;;  %2191 = vadd.xlane.f32.xlu0 %v2190_v23  ;;  %v2921_v40 = vpop.eup %2920 }
 0x618   : > { %v2167_v52 = vmul.f32 %v3909_v25, %v2144_v21  ;;  %v2130_v44 = vadd.f32 1.0, %v2921_v40  ;;  %v2147_v1 = vmul.f32 %v2131_v17, %v2083_v42  ;;  %v2199_v50 = vsel %vm2177_vm8, %v2168_v37, 0.0 }
 0x61a   : > { %v2923_v45 = vpop.eup %2922  ;;  %v2196_v53 = vsel %vm2177_vm8, %v2167_v52, 0.0  ;;  %v2146_v49 = vmul.f32 %v2130_v44, %v2082_v29  ;;  %v2170_v60 = vmul.f32 %v3909_v25, %v2147_v1 }
 0x61b   : > { %2194 = vadd.xlane.f32.xlu1 %v2193_v59  ;;  %2197 = vadd.xlane.f32.xlu0 %v2196_v53  ;;  %v2133_v11 = vadd.f32 1.0, %v2923_v45 }
 0x61c   : > { %v2925_v8 = vpop.eup %2924  ;;  %v2169_v2 = vmul.f32 %v3909_v25, %v2146_v49  ;;  %v2205_v26 = vsel %vm2177_vm8, %v2170_v60, 0.0 }
 0x61d   : > { %v2132_v12 = vadd.f32 1.0, %v2925_v8  ;;  %v2149_v47 = vmul.f32 %v2133_v11, %v2085_v38 }
 0x61e   : > { %v2927_v18 = vpop.eup %2926  ;;  %v2202_v6 = vsel %vm2177_vm8, %v2169_v2, 0.0 }
 0x61f   : > { %2200 = vadd.xlane.f32.xlu1 %v2199_v50  ;;  %v2148_v35 = vmul.f32 %v2132_v12, %v2084_v57  ;;  %v2135_v10 = vadd.f32 1.0, %v2927_v18  ;;  %2203 = vadd.xlane.f32.xlu0 %v2202_v6  ;;  %v2172_v0 = vmul.f32 %v3909_v25, %v2149_v47 }
 0x620   : > { %v2929_v61 = vpop.eup %2928 }
 0x621   : > { %v2171_v4 = vmul.f32 %v3909_v25, %v2148_v35  ;;  %v2134_v58 = vadd.f32 1.0, %v2929_v61  ;;  %v2151_v24 = vmul.f32 %v2135_v10, %v2087_v32  ;;  %v2211_v14 = vsel %vm2177_vm8, %v2172_v0, 0.0 }
 0x622   : > { %v2931_v39 = vpop.eup %2930 }
 0x623   : > { %2206 = vadd.xlane.f32.xlu1 %v2205_v26  ;;  %v2208_v33 = vsel %vm2177_vm8, %v2171_v4, 0.0  ;;  %v2150_v63 = vmul.f32 %v2134_v58, %v2086_v30  ;;  %v2137_v48 = vadd.f32 1.0, %v2931_v39  ;;  %v2174_v13 = vmul.f32 %v3909_v25, %v2151_v24 }
 0x624   : > { %v2933_v27 = vpop.eup %2932  ;;  %2209 = vadd.xlane.f32.xlu0 %v2208_v33 }
 0x625   : > { %v2173_v3 = vmul.f32 %v3909_v25, %v2150_v63  ;;  %v2136_v7 = vadd.f32 1.0, %v2933_v27  ;;  %v2153_v15 = vmul.f32 %v2137_v48, %v2089_v36  ;;  %v2217_v62 = vsel %vm2177_vm8, %v2174_v13, 0.0 }
 0x627   : > { %2212 = vadd.xlane.f32.xlu1 %v2211_v14  ;;  %v2214_v16 = vsel %vm2177_vm8, %v2173_v3, 0.0  ;;  %v2152_v19 = vmul.f32 %v2136_v7, %v2088_v20  ;;  %v2176_v54 = vmul.f32 %v3909_v25, %v2153_v15 }
 0x628   : > { %2215 = vadd.xlane.f32.xlu0 %v2214_v16 }
 0x629   : > { %v2175_v56 = vmul.f32 %v3909_v25, %v2152_v19  ;;  %v2223_v31 = vsel %vm2177_vm8, %v2176_v54, 0.0 }
 0x62b   : > { %2218 = vadd.xlane.f32.xlu1 %v2217_v62  ;;  %v2220_v22 = vsel %vm2177_vm8, %v2175_v56, 0.0 }
 0x62c   : > { %2221 = vadd.xlane.f32.xlu0 %v2220_v22 }
 0x62f   : > { %2224 = vadd.xlane.f32.xlu1 %v2223_v31 }
 0x696   : > { %v2183_v5 = vpop.xlane.xlu0 %2182 }
 0x697   : > { %v2234_v46 = vadd.f32 %v2460_v34, %v2183_v5 }
 0x69a   : > { %v2180_v41 = vpop.xlane.xlu0 %2179 }
 0x69b   : > { %v2233_v51 = vadd.f32 %v2460_v34, %v2180_v41 }
 0x69c   : > { %v2186_v43 = vpop.xlane.xlu1 %2185 }
 0x69d   : > { %2249 = vxpose.xlu0.b32.start [1/16] (narrow) %v2233_v51, 8  ;;  %v2235_v55 = vadd.f32 %v2460_v34, %v2186_v43 }
 0x6a0   : > { %v2189_v23 = vpop.xlane.xlu1 %2188  ;;  %v2192_v25 = vpop.xlane.xlu0 %2191 }
 0x6a1   : > { %2250 = vxpose.xlu0.b32.cont [2/16] (narrow) %v2234_v46, 8  ;;  %v2236_v28 = vadd.f32 %v2460_v34, %v2189_v23  ;;  %v2237_v21 = vadd.f32 %v2460_v34, %v2192_v25 }
 0x6a4   : > { %v2195_v9 = vpop.xlane.xlu1 %2194  ;;  %v2198_v40 = vpop.xlane.xlu0 %2197 }
 0x6a5   : > { %2251 = vxpose.xlu0.b32.cont [3/16] (narrow) %v2235_v55, 8  ;;  %v2238_v17 = vadd.f32 %v2460_v34, %v2195_v9  ;;  %v2239_v42 = vadd.f32 %v2460_v34, %v2198_v40 }
 0x6a8   : > { %v2201_v52 = vpop.xlane.xlu1 %2200  ;;  %v2204_v44 = vpop.xlane.xlu0 %2203 }
 0x6a9   : > { %2252 = vxpose.xlu0.b32.cont [4/16] (narrow) %v2236_v28, 8  ;;  %v2240_v29 = vadd.f32 %v2460_v34, %v2201_v52  ;;  %v2241_v45 = vadd.f32 %v2460_v34, %v2204_v44 }
 0x6ac   : > { %v2207_v59 = vpop.xlane.xlu1 %2206 }
 0x6ad   : > { %2253 = vxpose.xlu0.b32.cont [5/16] (narrow) %v2237_v21, 8  ;;  %v2242_v53 = vadd.f32 %v2460_v34, %v2207_v59  ;;  %v2210_v37 = vpop.xlane.xlu0 %2209 }
 0x6ae   : > { %v2243_v1 = vadd.f32 %v2460_v34, %v2210_v37 }
 0x6b0   : > { %v2213_v49 = vpop.xlane.xlu1 %2212 }
 0x6b1   : > { %2254 = vxpose.xlu0.b32.cont [6/16] (narrow) %v2238_v17, 8  ;;  %v2244_v11 = vadd.f32 %v2460_v34, %v2213_v49  ;;  %v2216_v8 = vpop.xlane.xlu0 %2215 }
 0x6b2   : > { %v2245_v38 = vadd.f32 %v2460_v34, %v2216_v8 }
 0x6b4   : > { %v2219_v57 = vpop.xlane.xlu1 %2218 }
 0x6b5   : > { %2255 = vxpose.xlu0.b32.cont [7/16] (narrow) %v2239_v42, 8  ;;  %v2246_v2 = vadd.f32 %v2460_v34, %v2219_v57  ;;  %v2222_v12 = vpop.xlane.xlu0 %2221 }
 0x6b6   : > { %v2247_v18 = vadd.f32 %v2460_v34, %v2222_v12 }
 0x6b8   : > { %v2225_v50 = vpop.xlane.xlu1 %2224 }
 0x6b9   : > { %2256 = vxpose.xlu0.b32.cont [8/16] (narrow) %v2240_v29, 8  ;;  %v2248_v60 = vadd.f32 %v2460_v34, %v2225_v50 }
 0x6bd   : > { %2257 = vxpose.xlu0.b32.cont [9/16] (narrow) %v2241_v45, 8 }
 0x6c1   : > { %2258 = vxpose.xlu0.b32.cont [10/16] (narrow) %v2242_v53, 8 }
 0x6c5   : > { %2259 = vxpose.xlu0.b32.cont [11/16] (narrow) %v2243_v1, 8 }
 0x6c9   : > { %2260 = vxpose.xlu0.b32.cont [12/16] (narrow) %v2244_v11, 8 }
 0x6cd   : > { %2261 = vxpose.xlu0.b32.cont [13/16] (narrow) %v2245_v38, 8 }
 0x6d1   : > { %2262 = vxpose.xlu0.b32.cont [14/16] (narrow) %v2246_v2, 8 }
 0x6d5   : > { %2263 = vxpose.xlu0.b32.cont [15/16] (narrow) %v2247_v18, 8 }
 0x6d9   : > { %2264 = vxpose.xlu0.b32.end [16/16] (narrow) %v2248_v60, 8 }
 0x719   : > { %v2265_v47 = vpop.trf.xlu0 }
 0x71a   : > { %2281 = vst [vmem:[%s3474_s24] sm:$0x1] %v2265_v47 }
 0x71b PF: > { %s2289_s15 = smul.u32 %s3018_s18, %s3022_s19  ;;  %s2298_s26 = sshll.u32 %s3474_s24, 4  ;;  %s2299_s26 = int_to_ptr.vmem [resolvable:$true] %s2298_s26 }
 0x71c   : > { %s2683_s23 = smul.u32 3, %s3026_s20  ;;  %s4082_s29 = sld [smem:[#allocation22_spill]] }
 0x71d   : > { %s4083_s0 = sand.u32 1, %s3010_s16   ;;  %s2934_s2 = scalar_lea.vmem %s2299_s26, 16 }
 0x71e   : > { %s2294_s27 = sadd.s32 %s2683_s23, %s2289_s15  ;;  %s2283_s1 = scalar_lea.sflag [#allocation6], %s4083_s0 }
 0x71f   : > { %s2461_s28 = sshll.u32 %s2294_s27, 4  ;;  %p2935_p10 = scmp.ne.s32.totalorder %s2299_s26, %s2934_s2 }
 0x720   : > { %s3047_s3 = smov [#allocation5]  }
 0x721   : > { %p2936_p11 = pnand %p2935_p10, %p3190_p5  ;;  %s2938_s4 = sshll.u32 %s3047_s3, 4  ;;  %s2939_s4 = int_to_ptr.vmem [resolvable:$false] %s2938_s4 }
 0x722   : > { %s2296_s14 = scalar_lea.hbm %s4082_s29, %s2461_s28  ;;  %s2940_s18 = scalar_lea.vmem %s2939_s4, 32 }
 0x723   : > { %p2937_p12 = pneg %p2936_p11  ;;  %p2941_p13 = scmp.lt.s32.totalorder %s2299_s26, %s2939_s4 }
 0x724   : > { %p2942_p0 = scmp.lt.s32.totalorder %s2940_s18, %s2934_s2 }
 0x726   : > { %p2943_p1 = por %p2942_p0, %p2941_p13 }
 0x728   : > { %p2944_p2 = pnand %p2943_p1, %p2937_p12 }
 0x72a   : > { %2947 = shalt.err (!%p2944_p2)
}
 0x72b   : > { %s2948_s19 = scalar_lea.hbm %s2296_s14, 16  ;;  %s2952_s24 = scalar_lea.hbm %s4082_s29, 96 }
 0x72c   : > { %p2949_p3 = scmp.ne.s32.totalorder %s2296_s14, %s2948_s19  ;;  %p2953_p8 = scmp.lt.s32.totalorder %s2296_s14, %s4082_s29 }
 0x72d   : > { %p2954_p9 = scmp.lt.s32.totalorder %s2952_s24, %s2948_s19 }
 0x72e   : > { %p2950_p4 = pnand %p2949_p3, %p3190_p5 }
 0x72f   : > { %p2955_p10 = por %p2954_p9, %p2953_p8 }
 0x730   : > { %p2951_p6 = pneg %p2950_p4 }
 0x732   : > { %p2956_p11 = pnand %p2955_p10, %p2951_p6 }
 0x734   : > { %2959 = shalt.err (!%p2956_p11)
}
 0x735   : > { %2684 = dma.vmem_to_hbm [thread:$0]  (%p3190_p5), %s2299_s26, 16, %s2296_s14, %s2283_s1  }
 0x736 PF: > { %s4084_s2 = sld [smem:[#allocation11_spill]] }
 0x737   : > { %s4085_s3 = sld [smem:[#allocation8_spill]] }
 0x73c   : > { %p2690_p12 = scmp.ge.s32.totalorder %s4084_s2, 2 }
 0x73d   : > { %s2310_s27 = sand.u32 1, %s4085_s3  }
 0x73e   : > { %p2687_p13 = pnand %p2690_p12, %p3199_p7  ;;  %s2311_s28 = scalar_lea.sflag [#allocation6], %s2310_s27 }
 0x740   : > { %p2688_p0 = pneg %p2687_p13 }
 0x742   : > { %3001 = dma.done.wait (%p2688_p0), %s2311_s28, 16  }
 0x743   : > { %3003 = vsyncadd (%p2688_p0), %s2311_s28, 4294967280  ;;  %s29_s23 = sadd.s32 1, %s4084_s2   ;;  %s4087_s18 = sld [smem:[#allocation9_spill]] }
 0x744   : > { %p26_p1 = scmp.ge.s32.totalorder %s29_s23, 14   ;;  %s4088_s19 = sld [smem:[#allocation10_spill]] }
 0x745   : > { %s4089_s21 = sld [smem:[#allocation12_spill]]  ;;  %s4092_s15 = smov %s3010_s16 }
 0x746   : > { %s4090_s22 = sld [smem:[#allocation14_spill]]  ;;  %s4093_s16 = smov %s3014_s17 }
 0x747   : > { %s4091_s1 = sld [smem:[#allocation16_spill]]  ;;  %s4094_s17 = smov %s3211_s30 }
 0x748   : > { %s4095_s20 = smov %s3038_s13 }
 0x749   :  { %28 = sbr.rel (!%p26_p1) target bundleno = 13 (0xd), region = 127 }
 0x74d   : > { %s4096_s13 = smov %s4091_s1 }
 0x74e   :  { %2315 = vsyncpa [#allocation6], 1 }
 0x74f   :  { %2317 = vsyncpa [#allocation6 + $0x1], 1 }

</bundles_post_ra>
